<compile_context>
chip_gen: v7x
topology: tpu7x:2x2x1
jax: 0.10.0
libtpu: 0.0.40
codegen_flags: <defaults>
</compile_context>

<pallas_src>
import functools

import jax
import jax.numpy as jnp
from jax.experimental import pallas as pl
from jax.experimental.pallas import tpu as pltpu

EPS = 1e-5
LANE = 128                     # channels padded to the 128-lane axis
_MXU_DTYPE = jnp.bfloat16      # MXU operand dtype (accumulation stays f32)
_COL0 = 8                      # sublane-aligned start column of the image in scratch
_WPAD = 16                     # scratch width = W + _WPAD (halo cols at _COL0-1 / _COL0+W)
_ROW_TILE = 8                  # output rows per grid step
_VMEM_LIMIT = 48 * 1024 * 1024


# ----------------------------------------------------------------------------
# Kernels
# ----------------------------------------------------------------------------
def _conv3x3_fused_kernel(x_ref, xt_ref, xb_ref, w_ref, isc_ref, ish_ref,
                          y_ref, ssum_ref, ssq_ref, xp_ref, im_ref,
                          *, W, TH, stride, n_row_tiles, fuse_input_bn_relu):
    """3x3 conv (pad=1, stride) for one (batch, row-tile) grid step.

    x_ref   : (1, TH*stride, W, Cin)   input rows of this tile
    xt_ref  : (1, 1, W, Cin)           row above the tile (clamped; masked at border)
    xb_ref  : (1, 1, W, Cin)           row below the tile (clamped; masked at border)
    w_ref   : (9*Cin, Cout) bf16       im2col weights, rows ordered (kh, kw, cin)
    isc/ish : (1, Cin)                 bn1 scale/shift fused into conv2's input
    y_ref   : (1, TH, Wo, Cout) f32    conv output (no bias -- cancelled by BN)
    ssum/ssq: (1, 1, 1, Cout)          per-tile channel sum / sum of squares
    xp_ref  : VMEM (TH*stride+2, W+_WPAD, Cin) f32   zero-padded activated input
    im_ref  : VMEM (TH*Wo, 9*Cin) bf16               im2col patch matrix
    """
    Cin = x_ref.shape[-1]
    Cout = w_ref.shape[-1]
    THs = TH * stride
    Wo = y_ref.shape[2]
    r = pl.program_id(1)

    def act(v):
        if fuse_input_bn_relu:
            return jnp.maximum(v * isc_ref[...] + ish_ref[...], 0.0)
        return v

    # Build the padded input tile.  Only the rows/columns that are actually
    # read are written (no full-scratch zeroing -- saves a store pass per step).
    top_ok = (r > 0).astype(jnp.float32)
    bot_ok = (r < n_row_tiles - 1).astype(jnp.float32)
    xp_ref[1:1 + THs, _COL0:_COL0 + W, :] = act(x_ref[0])
    xp_ref[0:1, _COL0:_COL0 + W, :] = act(xt_ref[0]) * top_ok
    xp_ref[1 + THs:2 + THs, _COL0:_COL0 + W, :] = act(xb_ref[0]) * bot_ok
    zcol = jnp.zeros((THs + 2, 1, Cin), jnp.float32)
    xp_ref[:, _COL0 - 1:_COL0, :] = zcol           # left zero-pad column
    xp_ref[:, _COL0 + W:_COL0 + W + 1, :] = zcol   # right zero-pad column

    # im2col: every 3x3 tap is one window of the padded tile (strided sublane
    # read for stride>1, free leading-dim reshape for the row decimation); the
    # conv becomes a single (TH*Wo, 9*Cin) x (9*Cin, Cout) bf16 MXU matmul.
    for kh in range(3):
        for kw in range(3):
            c0 = _COL0 - 1 + kw
            if stride == 1:
                win = xp_ref[kh:kh + TH, c0:c0 + Wo, :]
            else:
                win = xp_ref[kh:kh + THs, pl.ds(c0, Wo, stride=stride), :]
                win = win.reshape(TH, stride, Wo, Cin)[:, 0]   # free row decimation
            k = kh * 3 + kw
            im_ref[:, k * Cin:(k + 1) * Cin] = (
                win.reshape(TH * Wo, Cin).astype(_MXU_DTYPE))

    acc = jnp.dot(im_ref[...], w_ref[...], preferred_element_type=jnp.float32)

    # Whole-block store + fused BatchNorm partial sums (no extra HBM pass).
    y_ref[0] = acc.reshape(TH, Wo, Cout)
    ssum_ref[0, 0] = jnp.sum(acc, axis=0, keepdims=True)
    ssq_ref[0, 0] = jnp.sum(acc * acc, axis=0, keepdims=True)


def _bn_add_relu_identity_kernel(y_ref, sc_ref, sh_ref, x_ref, o_ref):
    # out = relu(bn2(y) + x)
    y = y_ref[0] * sc_ref[0] + sh_ref[0]
    o_ref[0] = jnp.maximum(y + x_ref[0], 0.0)


def _bn_add_relu_proj_kernel(y_ref, sc_ref, sh_ref, x_ref, w3_ref, b3_ref,
                             o_ref, *, stride):
    # out = relu(bn2(y) + conv1x1_stride(x) + b3).  The 1x1 conv is one
    # flattened matmul; the spatial decimation of x happens in-kernel.
    _, TH, Wo, C = y_ref.shape
    Cin = x_ref.shape[-1]
    y = (y_ref[0] * sc_ref[0] + sh_ref[0]).reshape(TH * Wo, C)
    if stride == 1:
        xs = x_ref[0]
    else:
        xs = x_ref[:, :, pl.ds(0, Wo, stride=stride), :]   # (1, TH*stride, Wo, Cin)
        xs = xs.reshape(TH, stride, Wo, Cin)[:, 0]          # free row decimation
    shortcut = jnp.dot(xs.reshape(TH * Wo, Cin).astype(_MXU_DTYPE), w3_ref[...],
                       preferred_element_type=jnp.float32) + b3_ref[...]
    o_ref[0] = jnp.maximum(y + shortcut, 0.0).reshape(TH, Wo, C)


# ----------------------------------------------------------------------------
# Pallas wrappers
# ----------------------------------------------------------------------------
def conv3x3_bn_stats(x, w, *, stride=1, in_scale=None, in_shift=None,
                     row_tile=_ROW_TILE):
    """Fused 3x3 conv (pad=1) + per-tile BatchNorm partial sums; optionally
    fuses a scale/shift + ReLU prologue on the input (bn1+relu -> conv2)."""
    N, H, W, Cin = x.shape
    Cout = w.shape[-1]
    if H % stride or W % stride:
        # TODO(synk): general strides; ResNet shapes (even H/W, stride<=2) covered.
        raise NotImplementedError("H, W must be divisible by the stride")
    Ho, Wo = H // stride, W // stride
    TH = min(row_tile, Ho)
    if Ho % TH:
        raise NotImplementedError("output height must divide by the row tile")
    nR = Ho // TH
    THs = TH * stride

    fuse = in_scale is not None
    isc = (in_scale.reshape(1, Cin).astype(jnp.float32) if fuse
           else jnp.ones((1, Cin), jnp.float32))
    ish = (in_shift.reshape(1, Cin).astype(jnp.float32) if fuse
           else jnp.zeros((1, Cin), jnp.float32))
    wim = w.reshape(9 * Cin, Cout).astype(_MXU_DTYPE)   # im2col weights, bf16

    kernel = functools.partial(
        _conv3x3_fused_kernel, W=W, TH=TH, stride=stride, n_row_tiles=nR,
        fuse_input_bn_relu=fuse)

    y, ssum, ssq = pl.pallas_call(
        kernel,
        out_shape=(jax.ShapeDtypeStruct((N, Ho, Wo, Cout), jnp.float32),
                   jax.ShapeDtypeStruct((N, nR, 1, Cout), jnp.float32),
                   jax.ShapeDtypeStruct((N, nR, 1, Cout), jnp.float32)),
        grid=(N, nR),
        in_specs=[
            pl.BlockSpec((1, THs, W, Cin), lambda n, r: (n, r, 0, 0)),
            # 1-row halos above / below the tile (element-row indices; clamped
            # at the image border and zero-masked inside the kernel).
            pl.BlockSpec((1, 1, W, Cin),
                         lambda n, r: (n, jnp.maximum(r * THs - 1, 0), 0, 0)),
            pl.BlockSpec((1, 1, W, Cin),
                         lambda n, r: (n, jnp.minimum(r * THs + THs, H - 1), 0, 0)),
            pl.BlockSpec((9 * Cin, Cout), lambda n, r: (0, 0)),
            pl.BlockSpec((1, Cin), lambda n, r: (0, 0)),
            pl.BlockSpec((1, Cin), lambda n, r: (0, 0)),
        ],
        out_specs=(
            pl.BlockSpec((1, TH, Wo, Cout), lambda n, r: (n, r, 0, 0)),
            pl.BlockSpec((1, 1, 1, Cout), lambda n, r: (n, r, 0, 0)),
            pl.BlockSpec((1, 1, 1, Cout), lambda n, r: (n, r, 0, 0)),
        ),
        scratch_shapes=[pltpu.VMEM((THs + 2, W + _WPAD, Cin), jnp.float32),
                        pltpu.VMEM((TH * Wo, 9 * Cin), _MXU_DTYPE)],
        compiler_params=pltpu.CompilerParams(
            dimension_semantics=("parallel", "parallel"),
            vmem_limit_bytes=_VMEM_LIMIT),
    )(x, x, x, wim, isc, ish)
    return y, ssum, ssq


def bn_shortcut_add_relu(y, scale, shift, x_short, w3=None, b3=None, *,
                         stride=1, row_tile=_ROW_TILE):
    """Fused epilogue: relu(bn2(y) + shortcut).  Shortcut is the identity or a
    strided 1x1 conv (+bias) computed in-kernel from full-resolution x."""
    N, Ho, Wo, C = y.shape
    TH = min(row_tile, Ho)
    if Ho % TH:
        raise NotImplementedError("output height must divide by the row tile")
    nR = Ho // TH
    scale = scale.reshape(1, C).astype(jnp.float32)
    shift = shift.reshape(1, C).astype(jnp.float32)
    y_spec = pl.BlockSpec((1, TH, Wo, C), lambda n, r: (n, r, 0, 0))
    vec_spec = pl.BlockSpec((1, C), lambda n, r: (0, 0))
    params = pltpu.CompilerParams(dimension_semantics=("parallel", "parallel"),
                                  vmem_limit_bytes=_VMEM_LIMIT)
    out_shape = jax.ShapeDtypeStruct((N, Ho, Wo, C), jnp.float32)

    if w3 is None:
        return pl.pallas_call(
            _bn_add_relu_identity_kernel,
            out_shape=out_shape, grid=(N, nR),
            in_specs=[y_spec, vec_spec, vec_spec, y_spec],
            out_specs=y_spec,
            compiler_params=params,
        )(y, scale, shift, x_short)

    Cin = x_short.shape[-1]
    x_spec = pl.BlockSpec((1, TH * stride, x_short.shape[2], Cin),
                          lambda n, r: (n, r, 0, 0))
    return pl.pallas_call(
        functools.partial(_bn_add_relu_proj_kernel, stride=stride),
        out_shape=out_shape, grid=(N, nR),
        in_specs=[y_spec, vec_spec, vec_spec, x_spec,
                  pl.BlockSpec((Cin, C), lambda n, r: (0, 0)),
                  vec_spec],
        out_specs=y_spec,
        compiler_params=params,
    )(y, scale, shift, x_short, w3.astype(_MXU_DTYPE), b3.reshape(1, C))


def _bn_affine(gamma, beta, ssum, ssq, count):
    """Batch mean / biased variance from fused partial sums -> scale/shift."""
    C = ssum.shape[-1]
    s = jnp.sum(ssum.reshape(-1, C), axis=0)
    q = jnp.sum(ssq.reshape(-1, C), axis=0)
    mean = s / count
    # TODO(synk): centered / Welford accumulation if activations ever have a
    # large mean-to-std ratio (E[x^2] - mean^2 cancellation).
    var = jnp.maximum(q / count - mean * mean, 0.0)
    scale = gamma / jnp.sqrt(var + EPS)
    shift = beta - mean * scale
    return scale, shift


# ----------------------------------------------------------------------------
# Residual forward (Pallas) and pure-JAX reference
# ----------------------------------------------------------------------------
def _round_up(n, m):
    return (n + m - 1) // m * m


def _pad_axis(a, axis, size, value=0.0):
    pad = size - a.shape[axis]
    if pad == 0:
        return a
    cfg = [(0, 0)] * a.ndim
    cfg[axis] = (0, pad)
    return jnp.pad(a, cfg, constant_values=value)


def residual_forward(x, p, use_1x1conv, strides):
    """Pallas forward of the Residual block.  x: (N, H, W, Cin) f32, NHWC."""
    N = x.shape[0]
    Cin = x.shape[-1]
    Cout = p["w1"].shape[-1]
    Cin_p, Cout_p = _round_up(Cin, LANE), _round_up(Cout, LANE)

    # Lane-dense layout: channels padded to a multiple of 128 so activations /
    # weights / stats are full-lane vregs and unmasked stores, and the MXU N/K
    # dims are filled.  Padded channels stay exactly zero end-to-end.
    xp = _pad_axis(x, 3, Cin_p)
    w1 = _pad_axis(_pad_axis(p["w1"], 2, Cin_p), 3, Cout_p)
    w2 = _pad_axis(_pad_axis(p["w2"], 2, Cout_p), 3, Cout_p)
    g1 = _pad_axis(p["g1"], 0, Cout_p, 1.0)
    bt1 = _pad_axis(p["bt1"], 0, Cout_p)
    g2 = _pad_axis(p["g2"], 0, Cout_p, 1.0)
    bt2 = _pad_axis(p["bt2"], 0, Cout_p)

    # conv1 + fused bn1 partial sums (conv bias dropped: cancelled by BN).
    y1, s1, q1 = conv3x3_bn_stats(xp, w1, stride=strides)
    sc1, sh1 = _bn_affine(g1, bt1, s1, q1, N * y1.shape[1] * y1.shape[2])
    # conv2 with fused bn1+relu prologue + fused bn2 partial sums.
    y2, s2, q2 = conv3x3_bn_stats(y1, w2, stride=1, in_scale=sc1, in_shift=sh1)
    sc2, sh2 = _bn_affine(g2, bt2, s2, q2, N * y2.shape[1] * y2.shape[2])
    # Fused bn2 + shortcut (+ strided 1x1 conv) + add + relu.
    if use_1x1conv:
        w3 = _pad_axis(_pad_axis(p["w3"], 0, Cin_p), 1, Cout_p)
        b3 = _pad_axis(p["b3"], 0, Cout_p)
        out = bn_shortcut_add_relu(y2, sc2, sh2, xp, w3, b3, stride=strides)
    else:
        out = bn_shortcut_add_relu(y2, sc2, sh2, xp)
    return out[..., :Cout]


def ref_forward(x, p, use_1x1conv, strides):
    """Pure-JAX reference.  Conv operands are cast to the same MXU dtype as
    the Pallas kernels (bf16 operands, f32 accumulation); BN / elementwise
    math stays f32 -- the same numerics as the kernels."""
    def conv(v, w, b, stride, pad):
        y = jax.lax.conv_general_dilated(
            v.astype(_MXU_DTYPE), w.astype(_MXU_DTYPE),
            window_strides=(stride, stride),
            padding=[(pad, pad), (pad, pad)],
            dimension_numbers=("NHWC", "HWIO", "NHWC"),
            preferred_element_type=jnp.float32)
        return y + b.reshape(1, 1, 1, -1)

    def bn(y, g, bt):
        m = jnp.mean(y, axis=(0, 1, 2))
        v = jnp.mean((y - m) ** 2, axis=(0, 1, 2))
        return (y - m) / jnp.sqrt(v + EPS) * g + bt

    y = jax.nn.relu(bn(conv(x, p["w1"], p["b1"], strides, 1), p["g1"], p["bt1"]))
    y = bn(conv(y, p["w2"], p["b2"], 1, 1), p["g2"], p["bt2"])
    xr = x
    if use_1x1conv:
        xr = conv(x, p["w3"].reshape(1, 1, *p["w3"].shape), p["b3"], strides, 0)
    return jax.nn.relu(y + xr)


def init_params(key, cin, cout, use_1x1conv):
    ks = jax.random.split(key, 6)
    p = {
        "w1": 0.1 * jax.random.normal(ks[0], (3, 3, cin, cout), jnp.float32),
        # b1/b2 are only used by the reference: they cancel under training-mode BN.
        "b1": 0.1 * jax.random.normal(ks[1], (cout,), jnp.float32),
        "w2": 0.1 * jax.random.normal(ks[2], (3, 3, cout, cout), jnp.float32),
        "b2": 0.1 * jax.random.normal(ks[3], (cout,), jnp.float32),
        "g1": jnp.ones((cout,), jnp.float32),
        "bt1": jnp.zeros((cout,), jnp.float32),
        "g2": jnp.ones((cout,), jnp.float32),
        "bt2": jnp.zeros((cout,), jnp.float32),
    }
    if use_1x1conv:
        p["w3"] = 0.1 * jax.random.normal(ks[4], (cin, cout), jnp.float32)
        p["b3"] = 0.1 * jax.random.normal(ks[5], (cout,), jnp.float32)
    return p


if __name__ == "__main__":
    key = jax.random.PRNGKey(0)
    kx, kp_a, kp_b = jax.random.split(key, 3)

    N, H, W, Cin = 2, 16, 16, 4
    x = jax.random.normal(kx, (N, H, W, Cin), jnp.float32)   # layout: NHWC

    # Config A: identity shortcut (use_1x1conv=False, stride 1, Cout == Cin).
    pA = init_params(kp_a, Cin, Cin, use_1x1conv=False)
    outA = residual_forward(x, pA, use_1x1conv=False, strides=1)
    refA = ref_forward(x, pA, use_1x1conv=False, strides=1)

    # Config B: projection shortcut (use_1x1conv=True, stride 2, Cout = 8).
    pB = init_params(kp_b, Cin, 8, use_1x1conv=True)
    outB = residual_forward(x, pB, use_1x1conv=True, strides=2)
    refB = ref_forward(x, pB, use_1x1conv=True, strides=2)

    jax.block_until_ready((outA, outB))

    assert outA.shape == (N, H, W, Cin), outA.shape
    assert outB.shape == (N, H // 2, W // 2, 8), outB.shape
    errA = float(jnp.max(jnp.abs(outA - refA)))
    errB = float(jnp.max(jnp.abs(outB - refB)))
    # bf16 MXU operands + f32 accumulation on both sides; tolerance covers the
    # remaining accumulation-order / BN-variance-formula noise.
    assert errA < 2e-2, errA
    assert errB < 2e-2, errB

    print("KERNEL_OK")
</pallas_src>

<mosaic_0001>
module attributes {stable_mosaic.version = 11 : i64} {
  func.func @_conv3x3_fused_kernel(%arg0: i32, %arg1: i32, %arg2: memref<1x8x16x128xf32, #tpu.memory_space<vmem>>, %arg3: memref<1x1x16x128xf32, #tpu.memory_space<vmem>>, %arg4: memref<1x1x16x128xf32, #tpu.memory_space<vmem>>, %arg5: memref<1152x128xbf16, #tpu.memory_space<vmem>>, %arg6: memref<1x128xf32, #tpu.memory_space<vmem>>, %arg7: memref<1x128xf32, #tpu.memory_space<vmem>>, %arg8: memref<1x8x16x128xf32, #tpu.memory_space<vmem>>, %arg9: memref<1x1x1x128xf32, #tpu.memory_space<vmem>>, %arg10: memref<1x1x1x128xf32, #tpu.memory_space<vmem>>, %arg11: memref<10x32x128xf32, #tpu.memory_space<vmem>>, %arg12: memref<128x1152xbf16, #tpu.memory_space<vmem>>) attributes {dimension_semantics = [#tpu.dimension_semantics<parallel>, #tpu.dimension_semantics<parallel>], iteration_bounds = array<i64: 2, 2>, scalar_prefetch = 0 : i64, scratch_operands = 2 : i64, tpu.core_type = #tpu.core_type<tc>, window_params = [{transform_indices = @transform_0, window_bounds = array<i64: 1, 8, 16, 128>}, {transform_indices = @transform_1, window_bounds = array<i64: 1, 1, 16, 128>}, {transform_indices = @transform_2, window_bounds = array<i64: 1, 1, 16, 128>}, {pipeline_mode = #tpu.pipeline_mode<synchronous>, transform_indices = @transform_3, window_bounds = array<i64: 1152, 128>}, {pipeline_mode = #tpu.pipeline_mode<synchronous>, transform_indices = @transform_4, window_bounds = array<i64: 1, 128>}, {pipeline_mode = #tpu.pipeline_mode<synchronous>, transform_indices = @transform_5, window_bounds = array<i64: 1, 128>}, {transform_indices = @transform_6, window_bounds = array<i64: 1, 8, 16, 128>}, {transform_indices = @transform_7, window_bounds = array<i64: 1, 1, 1, 128>}, {transform_indices = @transform_8, window_bounds = array<i64: 1, 1, 1, 128>}]} {
    %c0_i32 = arith.constant 0 : i32
    %0 = arith.cmpi sgt, %arg1, %c0_i32 : i32
    %1 = arith.extui %0 : i1 to i32
    %2 = arith.sitofp %1 : i32 to f32
    %c1_i32 = arith.constant 1 : i32
    %3 = arith.cmpi slt, %arg1, %c1_i32 : i32
    %4 = arith.extui %3 : i1 to i32
    %5 = arith.sitofp %4 : i32 to f32
    %c0 = arith.constant 0 : index
    %c0_0 = arith.constant 0 : index
    %c0_1 = arith.constant 0 : index
    %c0_2 = arith.constant 0 : index
    %6 = vector.load %arg2[%c0, %c0_0, %c0_1, %c0_2] : memref<1x8x16x128xf32, #tpu.memory_space<vmem>>, vector<1x8x16x128xf32>
    %7 = vector.shape_cast %6 : vector<1x8x16x128xf32> to vector<8x16x128xf32>
    %c1 = arith.constant 1 : index
    %c8 = arith.constant 8 : index
    %c0_3 = arith.constant 0 : index
    %8 = vector.load %arg11[%c1, %c8, %c0_3] : memref<10x32x128xf32, #tpu.memory_space<vmem>>, vector<8x16x128xf32>
    tpu.vector_store %arg11[%c1, %c8, %c0_3], %7 {strides = array<i32>} : memref<10x32x128xf32, #tpu.memory_space<vmem>>, vector<8x16x128xf32>,
    %c0_4 = arith.constant 0 : index
    %c0_5 = arith.constant 0 : index
    %c0_6 = arith.constant 0 : index
    %c0_7 = arith.constant 0 : index
    %9 = vector.load %arg3[%c0_4, %c0_5, %c0_6, %c0_7] : memref<1x1x16x128xf32, #tpu.memory_space<vmem>>, vector<1x1x16x128xf32>
    %10 = vector.shape_cast %9 : vector<1x1x16x128xf32> to vector<1x16x128xf32>
    %11 = vector.broadcast %2 : f32 to vector<1x16x128xf32>
    %12 = arith.mulf %10, %11 : vector<1x16x128xf32>
    %c0_8 = arith.constant 0 : index
    %c8_9 = arith.constant 8 : index
    %c0_10 = arith.constant 0 : index
    %13 = vector.load %arg11[%c0_8, %c8_9, %c0_10] : memref<10x32x128xf32, #tpu.memory_space<vmem>>, vector<1x16x128xf32>
    tpu.vector_store %arg11[%c0_8, %c8_9, %c0_10], %12 {strides = array<i32>} : memref<10x32x128xf32, #tpu.memory_space<vmem>>, vector<1x16x128xf32>,
    %c0_11 = arith.constant 0 : index
    %c0_12 = arith.constant 0 : index
    %c0_13 = arith.constant 0 : index
    %c0_14 = arith.constant 0 : index
    %14 = vector.load %arg4[%c0_11, %c0_12, %c0_13, %c0_14] : memref<1x1x16x128xf32, #tpu.memory_space<vmem>>, vector<1x1x16x128xf32>
    %15 = vector.shape_cast %14 : vector<1x1x16x128xf32> to vector<1x16x128xf32>
    %16 = vector.broadcast %5 : f32 to vector<1x16x128xf32>
    %17 = arith.mulf %15, %16 : vector<1x16x128xf32>
    %c9 = arith.constant 9 : index
    %c8_15 = arith.constant 8 : index
    %c0_16 = arith.constant 0 : index
    %18 = vector.load %arg11[%c9, %c8_15, %c0_16] : memref<10x32x128xf32, #tpu.memory_space<vmem>>, vector<1x16x128xf32>
    tpu.vector_store %arg11[%c9, %c8_15, %c0_16], %17 {strides = array<i32>} : memref<10x32x128xf32, #tpu.memory_space<vmem>>, vector<1x16x128xf32>,
    %cst = arith.constant 0.000000e+00 : f32
    %19 = vector.broadcast %cst : f32 to vector<10x1x128xf32>
    %c0_17 = arith.constant 0 : index
    %c7 = arith.constant 7 : index
    %c0_18 = arith.constant 0 : index
    %20 = vector.load %arg11[%c0_17, %c7, %c0_18] : memref<10x32x128xf32, #tpu.memory_space<vmem>>, vector<10x1x128xf32>
    tpu.vector_store %arg11[%c0_17, %c7, %c0_18], %19 {strides = array<i32>} : memref<10x32x128xf32, #tpu.memory_space<vmem>>, vector<10x1x128xf32>,
    %c0_19 = arith.constant 0 : index
    %c24 = arith.constant 24 : index
    %c0_20 = arith.constant 0 : index
    %21 = vector.load %arg11[%c0_19, %c24, %c0_20] : memref<10x32x128xf32, #tpu.memory_space<vmem>>, vector<10x1x128xf32>
    tpu.vector_store %arg11[%c0_19, %c24, %c0_20], %19 {strides = array<i32>} : memref<10x32x128xf32, #tpu.memory_space<vmem>>, vector<10x1x128xf32>,
    %c0_21 = arith.constant 0 : index
    %c7_22 = arith.constant 7 : index
    %c0_23 = arith.constant 0 : index
    %22 = vector.load %arg11[%c0_21, %c7_22, %c0_23] : memref<10x32x128xf32, #tpu.memory_space<vmem>>, vector<8x16x128xf32>
    %23 = vector.shape_cast %22 : vector<8x16x128xf32> to vector<128x128xf32>
    %24 = arith.truncf %23 : vector<128x128xf32> to vector<128x128xbf16>
    %c0_24 = arith.constant 0 : index
    %c0_25 = arith.constant 0 : index
    %25 = vector.load %arg12[%c0_24, %c0_25] : memref<128x1152xbf16, #tpu.memory_space<vmem>>, vector<128x128xbf16>
    tpu.vector_store %arg12[%c0_24, %c0_25], %24 {strides = array<i32>} : memref<128x1152xbf16, #tpu.memory_space<vmem>>, vector<128x128xbf16>,
    %c0_26 = arith.constant 0 : index
    %c8_27 = arith.constant 8 : index
    %c0_28 = arith.constant 0 : index
    %26 = vector.load %arg11[%c0_26, %c8_27, %c0_28] : memref<10x32x128xf32, #tpu.memory_space<vmem>>, vector<8x16x128xf32>
    %27 = vector.shape_cast %26 : vector<8x16x128xf32> to vector<128x128xf32>
    %28 = arith.truncf %27 : vector<128x128xf32> to vector<128x128xbf16>
    %c0_29 = arith.constant 0 : index
    %c128 = arith.constant 128 : index
    %29 = vector.load %arg12[%c0_29, %c128] : memref<128x1152xbf16, #tpu.memory_space<vmem>>, vector<128x128xbf16>
    tpu.vector_store %arg12[%c0_29, %c128], %28 {strides = array<i32>} : memref<128x1152xbf16, #tpu.memory_space<vmem>>, vector<128x128xbf16>,
    %c0_30 = arith.constant 0 : index
    %c9_31 = arith.constant 9 : index
    %c0_32 = arith.constant 0 : index
    %30 = vector.load %arg11[%c0_30, %c9_31, %c0_32] : memref<10x32x128xf32, #tpu.memory_space<vmem>>, vector<8x16x128xf32>
    %31 = vector.shape_cast %30 : vector<8x16x128xf32> to vector<128x128xf32>
    %32 = arith.truncf %31 : vector<128x128xf32> to vector<128x128xbf16>
    %c0_33 = arith.constant 0 : index
    %c256 = arith.constant 256 : index
    %33 = vector.load %arg12[%c0_33, %c256] : memref<128x1152xbf16, #tpu.memory_space<vmem>>, vector<128x128xbf16>
    tpu.vector_store %arg12[%c0_33, %c256], %32 {strides = array<i32>} : memref<128x1152xbf16, #tpu.memory_space<vmem>>, vector<128x128xbf16>,
    %c1_34 = arith.constant 1 : index
    %c7_35 = arith.constant 7 : index
    %c0_36 = arith.constant 0 : index
    %34 = vector.load %arg11[%c1_34, %c7_35, %c0_36] : memref<10x32x128xf32, #tpu.memory_space<vmem>>, vector<8x16x128xf32>
    %35 = vector.shape_cast %34 : vector<8x16x128xf32> to vector<128x128xf32>
    %36 = arith.truncf %35 : vector<128x128xf32> to vector<128x128xbf16>
    %c0_37 = arith.constant 0 : index
    %c384 = arith.constant 384 : index
    %37 = vector.load %arg12[%c0_37, %c384] : memref<128x1152xbf16, #tpu.memory_space<vmem>>, vector<128x128xbf16>
    tpu.vector_store %arg12[%c0_37, %c384], %36 {strides = array<i32>} : memref<128x1152xbf16, #tpu.memory_space<vmem>>, vector<128x128xbf16>,
    %c1_38 = arith.constant 1 : index
    %c8_39 = arith.constant 8 : index
    %c0_40 = arith.constant 0 : index
    %38 = vector.load %arg11[%c1_38, %c8_39, %c0_40] : memref<10x32x128xf32, #tpu.memory_space<vmem>>, vector<8x16x128xf32>
    %39 = vector.shape_cast %38 : vector<8x16x128xf32> to vector<128x128xf32>
    %40 = arith.truncf %39 : vector<128x128xf32> to vector<128x128xbf16>
    %c0_41 = arith.constant 0 : index
    %c512 = arith.constant 512 : index
    %41 = vector.load %arg12[%c0_41, %c512] : memref<128x1152xbf16, #tpu.memory_space<vmem>>, vector<128x128xbf16>
    tpu.vector_store %arg12[%c0_41, %c512], %40 {strides = array<i32>} : memref<128x1152xbf16, #tpu.memory_space<vmem>>, vector<128x128xbf16>,
    %c1_42 = arith.constant 1 : index
    %c9_43 = arith.constant 9 : index
    %c0_44 = arith.constant 0 : index
    %42 = vector.load %arg11[%c1_42, %c9_43, %c0_44] : memref<10x32x128xf32, #tpu.memory_space<vmem>>, vector<8x16x128xf32>
    %43 = vector.shape_cast %42 : vector<8x16x128xf32> to vector<128x128xf32>
    %44 = arith.truncf %43 : vector<128x128xf32> to vector<128x128xbf16>
    %c0_45 = arith.constant 0 : index
    %c640 = arith.constant 640 : index
    %45 = vector.load %arg12[%c0_45, %c640] : memref<128x1152xbf16, #tpu.memory_space<vmem>>, vector<128x128xbf16>
    tpu.vector_store %arg12[%c0_45, %c640], %44 {strides = array<i32>} : memref<128x1152xbf16, #tpu.memory_space<vmem>>, vector<128x128xbf16>,
    %c2 = arith.constant 2 : index
    %c7_46 = arith.constant 7 : index
    %c0_47 = arith.constant 0 : index
    %46 = vector.load %arg11[%c2, %c7_46, %c0_47] : memref<10x32x128xf32, #tpu.memory_space<vmem>>, vector<8x16x128xf32>
    %47 = vector.shape_cast %46 : vector<8x16x128xf32> to vector<128x128xf32>
    %48 = arith.truncf %47 : vector<128x128xf32> to vector<128x128xbf16>
    %c0_48 = arith.constant 0 : index
    %c768 = arith.constant 768 : index
    %49 = vector.load %arg12[%c0_48, %c768] : memref<128x1152xbf16, #tpu.memory_space<vmem>>, vector<128x128xbf16>
    tpu.vector_store %arg12[%c0_48, %c768], %48 {strides = array<i32>} : memref<128x1152xbf16, #tpu.memory_space<vmem>>, vector<128x128xbf16>,
    %c2_49 = arith.constant 2 : index
    %c8_50 = arith.constant 8 : index
    %c0_51 = arith.constant 0 : index
    %50 = vector.load %arg11[%c2_49, %c8_50, %c0_51] : memref<10x32x128xf32, #tpu.memory_space<vmem>>, vector<8x16x128xf32>
    %51 = vector.shape_cast %50 : vector<8x16x128xf32> to vector<128x128xf32>
    %52 = arith.truncf %51 : vector<128x128xf32> to vector<128x128xbf16>
    %c0_52 = arith.constant 0 : index
    %c896 = arith.constant 896 : index
    %53 = vector.load %arg12[%c0_52, %c896] : memref<128x1152xbf16, #tpu.memory_space<vmem>>, vector<128x128xbf16>
    tpu.vector_store %arg12[%c0_52, %c896], %52 {strides = array<i32>} : memref<128x1152xbf16, #tpu.memory_space<vmem>>, vector<128x128xbf16>,
    %c2_53 = arith.constant 2 : index
    %c9_54 = arith.constant 9 : index
    %c0_55 = arith.constant 0 : index
    %54 = vector.load %arg11[%c2_53, %c9_54, %c0_55] : memref<10x32x128xf32, #tpu.memory_space<vmem>>, vector<8x16x128xf32>
    %55 = vector.shape_cast %54 : vector<8x16x128xf32> to vector<128x128xf32>
    %56 = arith.truncf %55 : vector<128x128xf32> to vector<128x128xbf16>
    %c0_56 = arith.constant 0 : index
    %c1024 = arith.constant 1024 : index
    %57 = vector.load %arg12[%c0_56, %c1024] : memref<128x1152xbf16, #tpu.memory_space<vmem>>, vector<128x128xbf16>
    tpu.vector_store %arg12[%c0_56, %c1024], %56 {strides = array<i32>} : memref<128x1152xbf16, #tpu.memory_space<vmem>>, vector<128x128xbf16>,
    %c0_57 = arith.constant 0 : index
    %c0_58 = arith.constant 0 : index
    %58 = vector.load %arg12[%c0_57, %c0_58] : memref<128x1152xbf16, #tpu.memory_space<vmem>>, vector<128x1152xbf16>
    %c0_59 = arith.constant 0 : index
    %c0_60 = arith.constant 0 : index
    %59 = vector.load %arg5[%c0_59, %c0_60] : memref<1152x128xbf16, #tpu.memory_space<vmem>>, vector<1152x128xbf16>
    %cst_61 = arith.constant dense<0.000000e+00> : vector<128x128xf32>
    %60 = tpu.matmul %58, %59, %cst_61 {dimension_numbers = #tpu.dot_dimension_numbers<[1], [0], [0], [1], [0, 0, 1, 1], [], []>} : vector<128x1152xbf16>, vector<1152x128xbf16>, vector<128x128xf32> -> vector<128x128xf32>
    %61 = vector.shape_cast %60 : vector<128x128xf32> to vector<8x16x128xf32>
    %c0_62 = arith.constant 0 : index
    %c0_63 = arith.constant 0 : index
    %c0_64 = arith.constant 0 : index
    %c0_65 = arith.constant 0 : index
    %62 = vector.load %arg8[%c0_62, %c0_63, %c0_64, %c0_65] : memref<1x8x16x128xf32, #tpu.memory_space<vmem>>, vector<1x8x16x128xf32>
    %63 = vector.shape_cast %62 : vector<1x8x16x128xf32> to vector<8x16x128xf32>
    %64 = vector.shape_cast %61 : vector<8x16x128xf32> to vector<1x8x16x128xf32>
    tpu.vector_store %arg8[%c0_62, %c0_63, %c0_64, %c0_65], %64 {strides = array<i32>} : memref<1x8x16x128xf32, #tpu.memory_space<vmem>>, vector<1x8x16x128xf32>,
    %cst_66 = arith.constant dense<0.000000e+00> : vector<128xf32>
    %65 = vector.multi_reduction <add>, %60, %cst_66 [0] : vector<128x128xf32> to vector<128xf32>
    %66 = vector.shape_cast %65 : vector<128xf32> to vector<1x128xf32>
    %c0_67 = arith.constant 0 : index
    %c0_68 = arith.constant 0 : index
    %c0_69 = arith.constant 0 : index
    %c0_70 = arith.constant 0 : index
    %67 = vector.load %arg9[%c0_67, %c0_68, %c0_69, %c0_70] : memref<1x1x1x128xf32, #tpu.memory_space<vmem>>, vector<1x1x1x128xf32>
    %68 = vector.shape_cast %67 : vector<1x1x1x128xf32> to vector<1x128xf32>
    %69 = vector.shape_cast %66 : vector<1x128xf32> to vector<1x1x1x128xf32>
    tpu.vector_store %arg9[%c0_67, %c0_68, %c0_69, %c0_70], %69 {strides = array<i32>} : memref<1x1x1x128xf32, #tpu.memory_space<vmem>>, vector<1x1x1x128xf32>,
    %70 = arith.mulf %60, %60 : vector<128x128xf32>
    %cst_71 = arith.constant dense<0.000000e+00> : vector<128xf32>
    %71 = vector.multi_reduction <add>, %70, %cst_71 [0] : vector<128x128xf32> to vector<128xf32>
    %72 = vector.shape_cast %71 : vector<128xf32> to vector<1x128xf32>
    %c0_72 = arith.constant 0 : index
    %c0_73 = arith.constant 0 : index
    %c0_74 = arith.constant 0 : index
    %c0_75 = arith.constant 0 : index
    %73 = vector.load %arg10[%c0_72, %c0_73, %c0_74, %c0_75] : memref<1x1x1x128xf32, #tpu.memory_space<vmem>>, vector<1x1x1x128xf32>
    %74 = vector.shape_cast %73 : vector<1x1x1x128xf32> to vector<1x128xf32>
    %75 = vector.shape_cast %72 : vector<1x128xf32> to vector<1x1x1x128xf32>
    tpu.vector_store %arg10[%c0_72, %c0_73, %c0_74, %c0_75], %75 {strides = array<i32>} : memref<1x1x1x128xf32, #tpu.memory_space<vmem>>, vector<1x1x1x128xf32>,
    return
  }
  func.func @transform_0(%arg0: i32, %arg1: i32) -> (i32, i32, i32, i32) {
    %c0_i32 = arith.constant 0 : i32
    %c0_i32_0 = arith.constant 0 : i32
    %c0_i32_1 = arith.constant 0 : i32
    return %arg0, %arg1, %c0_i32, %c0_i32_0 : i32, i32, i32, i32
  }
  func.func @transform_1(%arg0: i32, %arg1: i32) -> (i32, i32, i32, i32) {
    %c8_i32 = arith.constant 8 : i32
    %0 = arith.muli %arg1, %c8_i32 : i32
    %c1_i32 = arith.constant 1 : i32
    %1 = arith.subi %0, %c1_i32 : i32
    %c0_i32 = arith.constant 0 : i32
    %2 = arith.maxsi %1, %c0_i32 : i32
    %c0_i32_0 = arith.constant 0 : i32
    %c0_i32_1 = arith.constant 0 : i32
    %c0_i32_2 = arith.constant 0 : i32
    return %arg0, %2, %c0_i32_0, %c0_i32_1 : i32, i32, i32, i32
  }
  func.func @transform_2(%arg0: i32, %arg1: i32) -> (i32, i32, i32, i32) {
    %c8_i32 = arith.constant 8 : i32
    %0 = arith.muli %arg1, %c8_i32 : i32
    %c8_i32_0 = arith.constant 8 : i32
    %1 = arith.addi %0, %c8_i32_0 : i32
    %c15_i32 = arith.constant 15 : i32
    %2 = arith.minsi %1, %c15_i32 : i32
    %c0_i32 = arith.constant 0 : i32
    %c0_i32_1 = arith.constant 0 : i32
    %c0_i32_2 = arith.constant 0 : i32
    return %arg0, %2, %c0_i32, %c0_i32_1 : i32, i32, i32, i32
  }
  func.func @transform_3(%arg0: i32, %arg1: i32) -> (i32, i32) {
    %c0_i32 = arith.constant 0 : i32
    %c0_i32_0 = arith.constant 0 : i32
    %c0_i32_1 = arith.constant 0 : i32
    return %c0_i32, %c0_i32_0 : i32, i32
  }
  func.func @transform_4(%arg0: i32, %arg1: i32) -> (i32, i32) {
    %c0_i32 = arith.constant 0 : i32
    %c0_i32_0 = arith.constant 0 : i32
    %c0_i32_1 = arith.constant 0 : i32
    return %c0_i32, %c0_i32_0 : i32, i32
  }
  func.func @transform_5(%arg0: i32, %arg1: i32) -> (i32, i32) {
    %c0_i32 = arith.constant 0 : i32
    %c0_i32_0 = arith.constant 0 : i32
    %c0_i32_1 = arith.constant 0 : i32
    return %c0_i32, %c0_i32_0 : i32, i32
  }
  func.func @transform_6(%arg0: i32, %arg1: i32) -> (i32, i32, i32, i32) {
    %c0_i32 = arith.constant 0 : i32
    %c0_i32_0 = arith.constant 0 : i32
    %c0_i32_1 = arith.constant 0 : i32
    return %arg0, %arg1, %c0_i32, %c0_i32_0 : i32, i32, i32, i32
  }
  func.func @transform_7(%arg0: i32, %arg1: i32) -> (i32, i32, i32, i32) {
    %c0_i32 = arith.constant 0 : i32
    %c0_i32_0 = arith.constant 0 : i32
    %c0_i32_1 = arith.constant 0 : i32
    return %arg0, %arg1, %c0_i32, %c0_i32_0 : i32, i32, i32, i32
  }
  func.func @transform_8(%arg0: i32, %arg1: i32) -> (i32, i32, i32, i32) {
    %c0_i32 = arith.constant 0 : i32
    %c0_i32_0 = arith.constant 0 : i32
    %c0_i32_1 = arith.constant 0 : i32
    return %arg0, %arg1, %c0_i32, %c0_i32_0 : i32, i32, i32, i32
  }
}

</mosaic_0001>

<bundles_post_ra>
// kernel: tpu_custom_call.1
= control target key start
LH: loop header
LB: loop body
LE: loop exit
PB: predicated region body
PF: predicated region fallthrough
CT: control target
= control target key end

     0   :  { %s4288_s0 = inlined_call_operand.hbm [shape: f32[2,16,16,128], index: 0, kind: input, shape index: {}]   ;;  %s4289_s1 = inlined_call_operand.hbm [shape: f32[2,16,16,128], index: 1, kind: input, shape index: {}]   ;;  %s4290_s2 = inlined_call_operand.hbm [shape: f32[2,16,16,128], index: 2, kind: input, shape index: {}]   ;;  %s4291_s3 = inlined_call_operand.hbm [shape: bf16[1152,128], index: 3, kind: input, shape index: {}]   ;;  %s4292_s4 = inlined_call_operand.vmem [shape: f32[1,128], index: 4, kind: input, shape index: {}]   ;;  %s4293_s5 = inlined_call_operand.vmem [shape: f32[1,128], index: 5, kind: input, shape index: {}]   ;;  %s4294_s6 = inlined_call_operand.hbm [shape: f32[2,16,16,128], index: 6, kind: output, shape index: {0}]   ;;  %s4295_s7 = inlined_call_operand.hbm [shape: f32[2,2,1,128], index: 7, kind: output, shape index: {1}]   ;;  %s4296_s8 = inlined_call_operand.hbm [shape: f32[2,2,1,128], index: 8, kind: output, shape index: {2}]  }
   0x1   :  { %4327 = sst [smem:[#allocation38_spill]] %s4288_s0 }
   0x2   :  { %4328 = sst [smem:[#allocation39_spill]] %s4289_s1 }
   0x3   :  { %4329 = sst [smem:[#allocation40_spill]] %s4290_s2 }
   0x4   :  { %4330 = sst [smem:[#allocation41_spill]] %s4291_s3 }
   0x5   :  { %4331 = sst [smem:[#allocation42_spill]] %s4294_s6 }
   0x6   :  { %4332 = sst [smem:[#allocation43_spill]] %s4295_s7 }
   0x7   :  { %4333 = sst [smem:[#allocation44_spill]] %s4296_s8 }
   0x8   :  { %14 = vsyncpa [#allocation5], 0 }
   0x9   :  { %16 = vsyncpa [#allocation5 + $0x1], 0 }
   0xa   :  { %17 = vsyncpa [#allocation8], 0 }
   0xb   :  { %19 = vsyncpa [#allocation8 + $0x1], 0 }
   0xc   :  { %20 = vsyncpa [#allocation11], 0 }
   0xd   :  { %21 = vsyncpa [#allocation6], 0 }
   0xe   :  { %23 = vsyncpa [#allocation6 + $0x1], 0 }
   0xf   :  { %24 = vsyncpa [#allocation14], 0 }
  0x10   :  { %26 = vsyncpa [#allocation14 + $0x1], 0  ;;  %s3402_s4 = smov 0   ;;  %s3404_s5 = smov 0  }
  0x11   :  { %s3406_s27 = smov 0   ;;  %s3408_s28 = smov 0  }
  0x12   :  { %s3410_s29 = smov 0   ;;  %s3412_s30 = smov 0  }
  0x13   :  { %s3414_s9 = smov 0   ;;  %s3416_s10 = smov 0  }
  0x14   :  { %s3418_s11 = smov 0   ;;  %s3420_s12 = smov 0  }
  0x15   :  { %s3422_s13 = smov 0   ;;  %s3424_s14 = smov 0  }
  0x16   :  { %s3426_s15 = smov 0   ;;  %s3428_s16 = smov 0  }
  0x17 LB: > { %4334 = sst [smem:[#allocation22_spill]] %s3289_s4  ;;  %s41_s17 = sadd.s32 1, %s3333_s14  ;;  %s3341_s16 = sphi %s3428_s16, %s32_s16   ;;  %s3337_s15 = sphi %s3426_s15, %s4410_s15   ;;  %s3333_s14 = sphi %s3424_s14, %s4417_s14   ;;  %s3329_s13 = sphi %s3422_s13, %s4408_s13   ;;  %s3325_s12 = sphi %s3420_s12, %s4416_s12   ;;  %s3321_s11 = sphi %s3418_s11, %s4406_s11   ;;  %s3317_s10 = sphi %s3416_s10, %s4415_s10   ;;  %s3313_s9 = sphi %s3414_s9, %s4414_s9   ;;  %s3309_s30 = sphi %s3412_s30, %s4404_s30   ;;  %s3305_s29 = sphi %s3410_s29, %s4413_s29   ;;  %s3301_s28 = sphi %s3408_s28, %s4412_s28   ;;  %s3297_s27 = sphi %s3406_s27, %s4411_s27   ;;  %s3293_s5 = sphi %s3404_s5, %s4402_s5   ;;  %s3289_s4 = sphi %s3402_s4, %s4401_s4  }
  0x18   : > { %4335 = sst [smem:[#allocation23_spill]] %s3293_s5  ;;  %s44_s18 = sadd.s32 1, %s3337_s15 }
  0x19   : > { %4336 = sst [smem:[#allocation24_spill]] %s3297_s27  ;;  %p42_p0 = scmp.ge.s32.totalorder %s41_s17, 2 }
  0x1a   : > { %4337 = sst [smem:[#allocation25_spill]] %s3309_s30  ;;  %p4311_p1 = scmp.eq.s32.totalorder %s3341_s16, 0 }
  0x1b   : > { %4338 = sst [smem:[#allocation26_spill]] %s3321_s11  ;;  %s2333_s19 = sshll.u32 %s3333_s14, 3 }
  0x1c   : > { %4339 = sst [smem:[#allocation27_spill]] %s3325_s12  ;;  %s89_s20 = sadd.s32 1, %s3309_s30 }
  0x1d   : > { %4340 = sst [smem:[#allocation28_spill]] %s3329_s13  ;;  %s4419_s17 = smov (%p42_p0, %s41_s17), 0 }
  0x1e   : > { %4341 = sst [smem:[#allocation29_spill]] %s3333_s14  ;;  %s4421_s18 = smov (!%p42_p0, %s44_s18), %s3337_s15 }
  0x1f   : > { %4342 = sst [smem:[#allocation30_spill]] %s3337_s15  ;;  %s49_s21 = ssub.s32 %s3333_s14, %s4419_s17 }
  0x20   : > { %4343 = sst [smem:[#allocation31_spill]] %s4419_s17  ;;  %s2334_s22 = sadd.s32 4294967295, %s2333_s19 }
  0x21   : > { %p46_p2 = scmp.ge.s32.totalorder %s4421_s18, 2  ;;  %p78_p3 = scmp.gt.s32.totalorder %s2334_s22, 0 }
  0x22   : > { %s2335_s23 = sshll.u32 %s4419_s17, 3  ;;  %p96_p4 = scmp.ne.s32.totalorder %s3309_s30, %s3305_s29 }
  0x23   : > { %s4423_s18 = smov (%p46_p2, %s4421_s18), 0  ;;  %s4425_s22 = smov (!%p78_p3, %s2334_s22), 0 }
  0x24   : > { %4344 = sst [smem:[#allocation32_spill]] %s4423_s18  ;;  %s3489_s24 = ssub.s32 %s3337_s15, %s4423_s18 }
  0x25   : > { %4345 = sst [smem:[#allocation33_spill]] %s3489_s24  ;;  %s2336_s25 = sadd.s32 4294967295, %s2335_s23 }
  0x26   : > { %s3492_s26 = sor.u32 %s49_s21, %s3489_s24  ;;  %p82_p5 = scmp.gt.s32.totalorder %s2336_s25, 0 }
  0x27   : > { %p3497_p7 = por %p96_p4, %p4311_p1  ;;  %p102_p8 = scmp.ne.s32.totalorder %s3305_s29, %s3301_s28 }
  0x28   : > { %s4427_s25 = smov (!%p82_p5, %s2336_s25), 0  ;;  %s3503_s18 = sadd.s32 8, %s2333_s19 }
  0x29   : > { %4347 = sst [smem:[#allocation34_spill]] %s3503_s18  ;;  %s85_s8 = ssub.s32 %s4425_s22, %s4427_s25 }
  0x2a   : > { %s86_s7 = sor.u32 %s85_s8, %s3489_s24  ;;  %s3507_s21 = sadd.s32 8, %s2335_s23 }
  0x2b   : > { %p87_p10 = scmp.eq.s32.totalorder %s86_s7, 0  ;;  %p4310_p12 = scmp.lt.s32.totalorder %s3341_s16, 4 }
  0x2c   : > { %s3515_s13 = sshll.u32 %s3337_s15, 5  ;;  %s352_s12 = sand.u32 1, %s3341_s16  }
  0x2d   : > { %s3512_s6 = scalar_select %p87_p10, %s3309_s30, %s89_s20  }
  0x2e   : > { %s354_s19 = sand.u32 1, %s3309_s30   ;;  %s2350_s4 = sshll.u32 %s4425_s22, 1 }
  0x2f   : > { %4348 = sst [smem:[#allocation35_spill]] %s3512_s6  ;;  %s2347_s2 = sshll.u32 %s354_s19, 4 }
  0x30   : > { %s366_s25 = sadd.s32 %s2350_s4, %s3515_s13  ;;  %s356_s8 = scalar_lea.vmem [#allocation7], %s2347_s2 }
  0x31   : > { %s2352_s5 = sshll.u32 %s366_s25, 7  ;;  %s369_s23 = sshll.u32 %s356_s8, 4  ;;  %s3525_s23 = int_to_ptr.vmem [resolvable:$true] %s369_s23 }
  0x32   : > { %s4349_s1 = sld [smem:[#allocation39_spill]]  ;;  %p3531_p13 = pnand %p4310_p12, %p3497_p7 }
  0x33   : > { %s3535_s2 = scalar_lea.sflag [#allocation8], %s352_s12 }
  0x34   : > { %p3007_p2 = pneg %p3531_p13 }
  0x38   : > { %s3523_s27 = scalar_lea.hbm %s4349_s1, %s2352_s5  ;;  %s3010_s17 = scalar_lea.hbm %s4349_s1, 8192 }
  0x39   : > { %s3005_s4 = scalar_lea.hbm %s3523_s27, 256  ;;  %p3011_p5 = scmp.lt.u32.totalorder %s3523_s27, %s4349_s1 }
  0x3a   : > { %p3006_p0 = scmp.ne.s32.totalorder %s3523_s27, %s3005_s4  ;;  %p3012_p7 = scmp.lt.u32.totalorder %s3010_s17, %s3005_s4 }
  0x3b   : > { %p3014_p11 = scmp.lt.u32.totalorder %s3005_s4, %s3523_s27 }
  0x3c   : > { %p3008_p3 = pnand %p3007_p2, %p3006_p0  ;;  %p3013_p10 = por %p3012_p7, %p3011_p5 }
  0x3e   : > { %p3009_p4 = pneg %p3008_p3  ;;  %p3015_p9 = por %p3014_p11, %p3013_p10 }
  0x40   : > { %p3016_p12 = pnand %p3015_p9, %p3009_p4 }
  0x42   : > { %3019 = shalt.err (!%p3016_p12)
}
  0x43   : > { %s3020_s12 = scalar_lea.vmem %s3525_s23, 256  ;;  %s3343_s24 = smov [#allocation7]  }
  0x44   : > { %p3021_p0 = scmp.ne.s32.totalorder %s3525_s23, %s3020_s12  ;;  %s3025_s19 = sshll.u32 %s3343_s24, 4  ;;  %s3026_s19 = int_to_ptr.vmem [resolvable:$false] %s3025_s19 }
  0x45   : > { %s3027_s25 = scalar_lea.vmem %s3026_s19, 512  ;;  %p3028_p6 = scmp.lt.s32.totalorder %s3525_s23, %s3026_s19 }
  0x46   : > { %p3023_p3 = pnand %p3021_p0, %p3007_p2  ;;  %p3029_p5 = scmp.lt.s32.totalorder %s3027_s25, %s3020_s12 }
  0x48   : > { %p3024_p1 = pneg %p3023_p3  ;;  %p3030_p7 = por %p3029_p5, %p3028_p6 }
  0x4a   : > { %p3031_p11 = pnand %p3030_p7, %p3024_p1 }
  0x4c   : > { %3034 = shalt.err (!%p3031_p11)
}
  0x4d   : > { %s4316_s8 = smov 128   ;;  %s4318_s4 = smov 8  }
  0x4e   : > { %2795 = dma.hbm_to_vmem [thread:$0]  (!%p3531_p13), %s3523_s27, 256, %s3525_s23, %s3535_s2, %s4316_s8, %s4316_s8, %s4318_s4  }
  0x4f   : > { %s3567_s5 = sadd.s32 4294967295, %s3341_s16   ;;  %p2339_p1 = scmp.ge.s32.totalorder %s3341_s16, 1 }
  0x50   : > { %p4312_p6 = scmp.eq.s32.totalorder %s3567_s5, 0  ;;  %p296_p12 = scmp.lt.s32.totalorder %s3341_s16, 5 }
  0x51   : > { %s3346_s27 = smov [#allocation10]   ;;  %s4354_s3 = sld [smem:[#allocation41_spill]] }
  0x52   : > { %p3578_p2 = por %p102_p8, %p4312_p6  ;;  %p3582_p4 = pnand %p2339_p1, %p296_p12 }
  0x53   : > { %s308_s23 = sshll.u32 %s3346_s27, 4  ;;  %s309_s23 = int_to_ptr.vmem [resolvable:$true] %s308_s23 }
  0x54   : > { %s4351_s18 = scalar_select %p3578_p2, 1, 0 }
  0x55   : > { %s4352_s7 = scalar_select %p3582_p4, 1, 0 }
  0x56   : > { %p2785_p13 = pneg %p3582_p4 }
  0x57   : > { %s3035_s22 = scalar_lea.hbm %s4354_s3, 9216 }
  0x58   : > { %p3590_p10 = pnand %p2785_p13, %p4312_p6  ;;  %p3036_p8 = scmp.ne.s32.totalorder %s4354_s3, %s3035_s22 }
  0x59   : > { %p3042_p7 = scmp.lt.u32.totalorder %s3035_s22, %s4354_s3 }
  0x5a   : > { %p3037_p0 = pneg %p3590_p10 }
  0x5c   : > { %p3038_p3 = pnand %p3037_p0, %p3036_p8 }
  0x5e   : > { %p3039_p5 = pneg %p3038_p3 }
  0x60   : > { %p3044_p11 = pnand %p3042_p7, %p3039_p5 }
  0x62   : > { %3047 = shalt.err (!%p3044_p11)
}
  0x63   : > { %s3048_s27 = scalar_lea.vmem %s309_s23, 9216  ;;  %p3056_p9 = scmp.lt.s32.totalorder %s309_s23, %s309_s23 }
  0x64   : > { %p3049_p1 = scmp.ne.s32.totalorder %s309_s23, %s3048_s27  ;;  %p3057_p6 = scmp.lt.s32.totalorder %s3048_s27, %s3048_s27 }
  0x66   : > { %p3051_p12 = pnand %p3049_p1, %p3037_p0  ;;  %p3058_p2 = por %p3057_p6, %p3056_p9 }
  0x68   : > { %p3052_p13 = pneg %p3051_p12 }
  0x6a   : > { %p3059_p4 = pnand %p3058_p2, %p3052_p13 }
  0x6c   : > { %3062 = shalt.err (!%p3059_p4)
}
  0x6d   : > { %s3347_s28 = smov 64   ;;  %s3348_s20 = smov 4  }
  0x6e   : > { %2788 = dma.hbm_to_vmem [thread:$0]  (!%p3590_p10), %s4354_s3, 9216, %s309_s23, [#allocation11], %s3347_s28, %s3347_s28, %s3348_s20  }
  0x6f   : > { %s4315_s24 = sadd.s32 4294967294, %s3341_s16   ;;  %s53_s19 = sadd.s32 1, %s3321_s11 }
  0x70   : > { %p4355_p6 = scmp.eq.s32.totalorder %s3492_s26, 0  ;;  %p60_p9 = scmp.ne.s32.totalorder %s3321_s11, %s3317_s10 }
  0x71   : > { %p66_p2 = scmp.ne.s32.totalorder %s3317_s10, %s3313_s9  ;;  %p233_p4 = scmp.eq.s32.totalorder %s4315_s24, 3 }
  0x72   : > { %s3615_s25 = scalar_select %p4355_p6, %s3321_s11, %s53_s19  }
  0x73   : > { %s328_s27 = sand.u32 1, %s3321_s11   ;;  %p4357_p8 = scmp.eq.s32.totalorder %s3341_s16, 0 }
  0x74   : > { %4356 = sst [smem:[#allocation36_spill]] %s3615_s25  ;;  %p4358_p3 = scmp.eq.s32.totalorder %s3567_s5, 0 }
  0x75   : > { %p62_p0 = por %p4357_p8, %p60_p9  ;;  %p4360_p7 = scmp.eq.s32.totalorder %s3567_s5, 3 }
  0x76   : > { %p3628_p5 = por %p4358_p3, %p66_p2  ;;  %p3638_p11 = por %p233_p4, %p66_p2 }
  0x77   : > { %p3634_p10 = por %p4360_p7, %p60_p9  ;;  %s2342_s28 = sshll.u32 %s328_s27, 7 }
  0x78   : > { %s4362_s26 = scalar_select %p3638_p11, 1, 0 }
  0x79   : > { %s4361_s23 = scalar_select %p3634_p10, 1, 0 }
  0x7a   : > { %4363 = sst [smem:[#allocation37_spill]] %s4362_s26  ;;  %s2447_s20 = sshll.u32 %s3333_s14, 4 }
  0x7b   : > { %s339_s22 = sadd.s32 %s2447_s20, %s3515_s13  ;;  %s332_s12 = scalar_lea.vmem [#allocation4], %s2342_s28 }
  0x7c   : > { %s342_s19 = sshll.u32 %s332_s12, 4  ;;  %s2346_s24 = sshll.u32 %s339_s22, 7  ;;  %s3644_s19 = int_to_ptr.vmem [resolvable:$true] %s342_s19 }
  0x7d   : > { %s4364_s0 = sld [smem:[#allocation38_spill]]  ;;  %p4365_p1 = scmp.lt.s32.totalorder %s3341_s16, 4 }
  0x7e   : > { %s3657_s28 = scalar_lea.sflag [#allocation5], %s328_s27 }
  0x7f   : > { %p3653_p12 = pnand %p4365_p1, %p62_p0 }
  0x81   : > { %p3065_p6 = pneg %p3653_p12 }
  0x83   : > { %s3649_s1 = scalar_lea.hbm %s4364_s0, %s2346_s24  ;;  %s3068_s24 = scalar_lea.hbm %s4364_s0, 8192 }
  0x84   : > { %s3063_s20 = scalar_lea.hbm %s3649_s1, 2048  ;;  %p3069_p4 = scmp.lt.u32.totalorder %s3649_s1, %s4364_s0 }
  0x85   : > { %p3064_p13 = scmp.ne.s32.totalorder %s3649_s1, %s3063_s20  ;;  %p3070_p8 = scmp.lt.u32.totalorder %s3068_s24, %s3063_s20 }
  0x86   : > { %p3072_p3 = scmp.lt.u32.totalorder %s3063_s20, %s3649_s1 }
  0x87   : > { %p3066_p9 = pnand %p3065_p6, %p3064_p13  ;;  %p3071_p0 = por %p3070_p8, %p3069_p4 }
  0x89   : > { %p3067_p2 = pneg %p3066_p9  ;;  %p3073_p7 = por %p3072_p3, %p3071_p0 }
  0x8b   : > { %p3074_p1 = pnand %p3073_p7, %p3067_p2 }
  0x8d   : > { %3077 = shalt.err (!%p3074_p1)
}
  0x8e   : > { %s3078_s27 = scalar_lea.vmem %s3644_s19, 2048  ;;  %s3349_s8 = smov [#allocation4]  }
  0x8f   : > { %p3079_p13 = scmp.ne.s32.totalorder %s3644_s19, %s3078_s27  ;;  %s3083_s4 = sshll.u32 %s3349_s8, 4  ;;  %s3084_s4 = int_to_ptr.vmem [resolvable:$false] %s3083_s4 }
  0x90   : > { %s3085_s22 = scalar_lea.vmem %s3084_s4, 4096  ;;  %p3086_p10 = scmp.lt.s32.totalorder %s3644_s19, %s3084_s4 }
  0x91   : > { %p3081_p9 = pnand %p3079_p13, %p3065_p6  ;;  %p3087_p4 = scmp.lt.s32.totalorder %s3085_s22, %s3078_s27 }
  0x93   : > { %p3082_p11 = pneg %p3081_p9  ;;  %p3088_p8 = por %p3087_p4, %p3086_p10 }
  0x95   : > { %p3089_p0 = pnand %p3088_p8, %p3082_p11 }
  0x97   : > { %3092 = shalt.err (!%p3089_p0)
}
  0x98   : > { %s4367_s20 = smov 8   ;;  %s4368_s24 = smov 128  }
  0x99   : > { %s4369_s12 = sld [smem:[#allocation24_spill]]  ;;  %s4370_s0 = sld [smem:[#allocation34_spill]] }
  0x9a   : > { %s4371_s8 = sld [smem:[#allocation23_spill]]  ;;  %s4372_s4 = sld [smem:[#allocation22_spill]] }
  0x9b   : > { %s4373_s27 = sld [smem:[#allocation33_spill]]  ;;  %p4375_p11 = scmp.lt.s32.totalorder %s3507_s21, 15 }
  0x9c   : > { %2792 = dma.hbm_to_vmem [thread:$0]  (!%p3653_p12), %s3649_s1, 2048, %s3644_s19, %s3657_s28, %s4368_s24, %s4368_s24, %s4367_s20  }
  0x9d   : > { %s4431_s21 = smov (!%p4375_p11, %s3507_s21), 15  ;;  %p4376_p3 = scmp.eq.s32.totalorder %s3341_s16, 0 }
  0x9e   : > { %p4377_p13 = scmp.eq.s32.totalorder %s3567_s5, 0  ;;  %s4379_s30 = sld [smem:[#allocation40_spill]] }
  0x9f   : > { %s125_s3 = sadd.s32 1, %s4369_s12  ;;  %p4374_p10 = scmp.lt.s32.totalorder %s4370_s0, 15 }
  0xa0   : > { %p132_p6 = scmp.ne.s32.totalorder %s4369_s12, %s4371_s8  ;;  %p138_p2 = scmp.ne.s32.totalorder %s4371_s8, %s4372_s4 }
  0xa1   : > { %s4429_s0 = smov (!%p4374_p10, %s4370_s0), 15  ;;  %s381_s15 = sand.u32 1, %s4369_s12  }
  0xa2   : > { %s121_s22 = ssub.s32 %s4429_s0, %s4431_s21  ;;  %p134_p7 = por %p132_p6, %p4376_p3 }
  0xa3   : > { %s122_s14 = sor.u32 %s121_s22, %s4373_s27  ;;  %p3705_p9 = por %p138_p2, %p4377_p13 }
  0xa4   : > { %p123_p1 = scmp.eq.s32.totalorder %s122_s14, 0  ;;  %s2353_s1 = sshll.u32 %s381_s15, 4 }
  0xa5   : > { %s4378_s25 = scalar_select %p3705_p9, 1, 0 }
  0xa6   : > { %s2355_s19 = sshll.u32 %s4429_s0, 1  ;;  %s4433_s12 = smov (!%p123_p1, %s4369_s12), %s125_s3 }
  0xa7   : > { %s393_s28 = sadd.s32 %s2355_s19, %s3515_s13  ;;  %s383_s6 = scalar_lea.vmem [#allocation9], %s2353_s1 }
  0xa8   : > { %s2357_s11 = sshll.u32 %s393_s28, 7  ;;  %s396_s8 = sshll.u32 %s383_s6, 4  ;;  %s3718_s8 = int_to_ptr.vmem [resolvable:$true] %s396_s8 }
  0xa9   : > { %s4380_s26 = smov %s4379_s30  ;;  %s3716_s27 = scalar_lea.hbm %s4379_s30, %s2357_s11 }
  0xaa   : > { %p4381_p12 = scmp.lt.s32.totalorder %s3341_s16, 4  ;;  %s3093_s13 = scalar_lea.hbm %s3716_s27, 256 }
  0xab   : > { %p3094_p8 = scmp.ne.s32.totalorder %s3716_s27, %s3093_s13  ;;  %s3098_s11 = scalar_lea.hbm %s4380_s26, 8192 }
  0xac   : > { %p3722_p4 = pnand %p4381_p12, %p134_p7  ;;  %p3099_p6 = scmp.lt.u32.totalorder %s3716_s27, %s4380_s26 }
  0xad   : > { %p3100_p2 = scmp.lt.u32.totalorder %s3098_s11, %s3093_s13  ;;  %p3102_p7 = scmp.lt.u32.totalorder %s3093_s13, %s3716_s27 }
  0xae   : > { %p3095_p0 = pneg %p3722_p4 }
  0xaf   : > { %p3101_p3 = por %p3100_p2, %p3099_p6 }
  0xb0   : > { %p3096_p10 = pnand %p3095_p0, %p3094_p8 }
  0xb1   : > { %p3103_p1 = por %p3102_p7, %p3101_p3 }
  0xb2   : > { %p3097_p11 = pneg %p3096_p10 }
  0xb4   : > { %p3104_p13 = pnand %p3103_p1, %p3097_p11 }
  0xb6   : > { %3107 = shalt.err (!%p3104_p13)
}
  0xb7   : > { %s3108_s3 = scalar_lea.vmem %s3718_s8, 256  ;;  %s3350_s22 = smov [#allocation9]  }
  0xb8   : > { %p3109_p12 = scmp.ne.s32.totalorder %s3718_s8, %s3108_s3  ;;  %s3113_s1 = sshll.u32 %s3350_s22, 4  ;;  %s3114_s1 = int_to_ptr.vmem [resolvable:$false] %s3113_s1 }
  0xb9   : > { %s3115_s19 = scalar_lea.vmem %s3114_s1, 512  ;;  %p3116_p9 = scmp.lt.s32.totalorder %s3718_s8, %s3114_s1 }
  0xba   : > { %p3111_p8 = pnand %p3109_p12, %p3095_p0  ;;  %p3117_p6 = scmp.lt.s32.totalorder %s3115_s19, %s3108_s3 }
  0xbc   : > { %p3112_p10 = pneg %p3111_p8  ;;  %p3118_p2 = por %p3117_p6, %p3116_p9 }
  0xbe   : > { %p3119_p3 = pnand %p3118_p2, %p3112_p10 }
  0xc0   : > { %3122 = shalt.err (!%p3119_p3)
}
  0xc1   : > { %2798 = dma.hbm_to_vmem [thread:$0]  (!%p3722_p4), %s3716_s27, 256, %s3718_s8, %s3535_s2, %s4368_s24, %s4368_s24, %s4367_s20  }
  0xc2   : > { %p4383_p0 = scmp.ne.s32.totalorder %s4352_s7, 0 }
  0xc3   : > { %s3758_s28 = sand.u32 (!%p4383_p0), 1, %s3317_s10  }
  0xc4   : > { %408 = sbr.rel (%p4383_p0) target bundleno = 691 (0x2b3), region = 44  ;;  %s2359_s4 = sshll.u32 (!%p4383_p0), %s3758_s28, 7 }
  0xc5   : > { %s411_s21 = scalar_lea.sflag (!%p4383_p0), [#allocation5], %s3758_s28  ;;  %s3764_s0 = scalar_lea.vmem (!%p4383_p0), [#allocation4], %s2359_s4 }
  0xcb   : > { %3264 = dma.done.wait (%p3628_p5), %s411_s21, 2048  }
  0xcc   : > { %3266 = vsyncadd (%p3628_p5), %s411_s21, 4294965248  ;;  %s419_s2 = sand.u32 1, %s3567_s5   ;;  %s421_s7 = sand.u32 1, %s3305_s29  }
  0xcd   : > { %s3772_s20 = sshll.u32 %s421_s7, 4  ;;  %s420_s24 = scalar_lea.sflag [#allocation8], %s419_s2 }
  0xce   : > { %s423_s8 = scalar_lea.vmem [#allocation7], %s3772_s20  ;;  %p4384_p9 = scmp.ne.s32.totalorder %s4351_s18, 0 }
  0xd0   : > { %3268 = dma.done.wait (%p4384_p9), %s420_s24, 256  }
  0xd1   : > { %3270 = vsyncadd (%p4384_p9), %s420_s24, 4294967040  ;;  %s4385_s27 = sld [smem:[#allocation23_spill]]  ;;  %p4386_p5 = scmp.ne.s32.totalorder %s4378_s25, 0 }
  0xd7   : > { %s430_s17 = sand.u32 1, %s4385_s27  }
  0xd8   : > { %s3782_s13 = sshll.u32 %s430_s17, 4 }
  0xd9   : > { %s432_s6 = scalar_lea.vmem [#allocation9], %s3782_s13 }
  0xda   : > { %3272 = dma.done.wait (%p4386_p5), %s420_s24, 256  }
  0xdb   : > { %3274 = vsyncadd (%p4386_p5), %s420_s24, 4294967040  ;;  %p4387_p4 = scmp.eq.s32.totalorder %s3567_s5, 0 }
  0xdd   : > { %3276 = dma.done.wait (%p4387_p4), [#allocation11], 9216   ;;  %p4388_p11 = pmov %p4387_p4 }
  0xde   : > { %v3351_v0 = vmov 0.0   ;;  %s4389_s18 = sld [smem:[#allocation27_spill]]  ;;  %v2933_v1 = vld [vmem:[#allocation10 + $0x40] sm:$0xff]   ;;  %v2937_v5 = vld [vmem:[#allocation10 + $0x48] sm:$0xff]   ;;  %v2941_v9 = vld [vmem:[#allocation10 + $0x50] sm:$0xff]   ;;  %s4390_s15 = sld [smem:[#allocation28_spill]] }
  0xdf   : > { %3278 = vsyncadd (%p4388_p11), [#allocation11], 4294958080  ;;  %553 = vst [vmem:[#allocation2 + $0x27] sm:$0x1] %v3351_v0  ;;  %v2934_v2 = vld [vmem:[#allocation10 + $0xc0] sm:$0xff]   ;;  %2449 = vmatprep.subr.bf16.mxu0 %v2933_v1  ;;  %v2938_v6 = vld [vmem:[#allocation10 + $0xc8] sm:$0xff]  }
  0xe0   : > { %552 = vst [vmem:[#allocation2 + $0x7] sm:$0x1] %v3351_v0  ;;  %554 = vst [vmem:[#allocation2 + $0x47] sm:$0x1] %v3351_v0  ;;  %v2935_v3 = vld [vmem:[#allocation10] sm:$0xff]   ;;  %2513 = vmatprep.subr.bf16.mxu1 %v2934_v2  ;;  %v2939_v7 = vld [vmem:[#allocation10 + $0x8] sm:$0xff]  }
  0xe1   : > { %555 = vst [vmem:[#allocation2 + $0x67] sm:$0x1] %v3351_v0  ;;  %556 = vst [vmem:[#allocation2 + $0x87] sm:$0x1] %v3351_v0  ;;  %v2936_v4 = vld [vmem:[#allocation10 + $0x80] sm:$0xff]   ;;  %2450 = vmatpush3.bf16.msra.mxu0 %v2935_v3  ;;  %v2940_v8 = vld [vmem:[#allocation10 + $0x88] sm:$0xff]  }
  0xe2   : > { %557 = vst [vmem:[#allocation2 + $0xa7] sm:$0x1] %v3351_v0  ;;  %558 = vst [vmem:[#allocation2 + $0xc7] sm:$0x1] %v3351_v0  ;;  %2514 = vmatpush3.bf16.msra.mxu1 %v2936_v4  ;;  %2451 = vmatprep.subr.bf16.mxu0 %v2937_v5  ;;  %v2942_v10 = vld [vmem:[#allocation10 + $0xd0] sm:$0xff]   ;;  %v2945_v13 = vld [vmem:[#allocation10 + $0x58] sm:$0xff]  }
  0xe3   : > { %559 = vst [vmem:[#allocation2 + $0xe7] sm:$0x1] %v3351_v0  ;;  %560 = vst [vmem:[#allocation2 + $0x107] sm:$0x1] %v3351_v0  ;;  %2515 = vmatprep.subr.bf16.mxu1 %v2938_v6  ;;  %v2943_v11 = vld [vmem:[#allocation10 + $0x10] sm:$0xff]   ;;  %v2946_v14 = vld [vmem:[#allocation10 + $0xd8] sm:$0xff]  }
  0xe4   : > { %561 = vst [vmem:[#allocation2 + $0x127] sm:$0x1] %v3351_v0  ;;  %562 = vst [vmem:[#allocation2 + $0x18] sm:$0x1] %v3351_v0  ;;  %p498_p7 = scmp.gt.s32.totalorder %s4389_s18, 0  ;;  %v2944_v12 = vld [vmem:[#allocation10 + $0x90] sm:$0xff]  }
  0xe5   : > { %563 = vst [vmem:[#allocation2 + $0x38] sm:$0x1] %v3351_v0  ;;  %564 = vst [vmem:[#allocation2 + $0x58] sm:$0x1] %v3351_v0  ;;  %2452 = vmatpush3.bf16.msra.mxu0 %v2939_v7  ;;  %v2947_v15 = vld [vmem:[#allocation10 + $0x18] sm:$0xff]   ;;  %v2949_v17 = vld [vmem:[#allocation10 + $0x60] sm:$0xff]  }
  0xe6   : > { %565 = vst [vmem:[#allocation2 + $0x78] sm:$0x1] %v3351_v0  ;;  %566 = vst [vmem:[#allocation2 + $0x98] sm:$0x1] %v3351_v0  ;;  %s3794_s25 = scalar_select %p498_p7, 1, 0  ;;  %2516 = vmatpush3.bf16.msra.mxu1 %v2940_v8  ;;  %2453 = vmatprep.subr.bf16.mxu0 %v2941_v9 }
  0xe7   : > { %567 = vst [vmem:[#allocation2 + $0xb8] sm:$0x1] %v3351_v0  ;;  %568 = vst [vmem:[#allocation2 + $0xd8] sm:$0x1] %v3351_v0  ;;  %2517 = vmatprep.subr.bf16.mxu1 %v2942_v10  ;;  %v2948_v16 = vld [vmem:[#allocation10 + $0x98] sm:$0xff]   ;;  %v2950_v18 = vld [vmem:[#allocation10 + $0xe0] sm:$0xff]  }
  0xe8   : > { %569 = vst [vmem:[#allocation2 + $0xf8] sm:$0x1] %v3351_v0  ;;  %570 = vst [vmem:[#allocation2 + $0x118] sm:$0x1] %v3351_v0  ;;  %v2951_v19 = vld [vmem:[#allocation10 + $0x20] sm:$0xff]   ;;  %v2953_v21 = vld [vmem:[#allocation10 + $0x68] sm:$0xff]   ;;  %s500_s30 = scvt.s32.f32 %s3794_s25 }
  0xe9   : > { %571 = vst [vmem:[#allocation2 + $0x138] sm:$0x1] %v3351_v0  ;;  %2454 = vmatpush3.bf16.msra.mxu0 %v2943_v11  ;;  %v2952_v20 = vld [vmem:[#allocation10 + $0xa0] sm:$0xff]   ;;  %v2954_v22 = vld [vmem:[#allocation10 + $0xe8] sm:$0xff]   ;;  %v2957_v25 = vld [vmem:[#allocation10 + $0x70] sm:$0xff]   ;;  %p501_p1 = scmp.lt.s32.totalorder %s4389_s18, 1 }
  0xea   : > { %2518 = vmatpush3.bf16.msra.mxu1 %v2944_v12  ;;  %2455 = vmatprep.subr.bf16.mxu0 %v2945_v13  ;;  %v2955_v23 = vld [vmem:[#allocation10 + $0x28] sm:$0xff]   ;;  %v2958_v26 = vld [vmem:[#allocation10 + $0xf0] sm:$0xff]   ;;  %v2961_v29 = vld [vmem:[#allocation10 + $0x78] sm:$0xff]   ;;  %v539_v32 = vstv %s500_s30  ;;  %s4060_s3 = scalar_lea.vmem [#allocation12], %s2359_s4  ;;  %s2448_s22 = sshll.u32 %s4389_s18, 4 }
  0xeb   : > { %2519 = vmatprep.subr.bf16.mxu1 %v2946_v14  ;;  %v2956_v24 = vld [vmem:[#allocation10 + $0xa8] sm:$0xff]   ;;  %v2959_v27 = vld [vmem:[#allocation10 + $0x30] sm:$0xff]   ;;  %v2962_v30 = vld [vmem:[#allocation10 + $0xf8] sm:$0xff]   ;;  %s3897_s11 = scalar_select %p501_p1, 1, 0 }
  0xec   : > { %v2960_v28 = vld [vmem:[#allocation10 + $0xb0] sm:$0xff]   ;;  %v2963_v31 = vld [vmem:[#allocation10 + $0x38] sm:$0xff]   ;;  %v504_v36 = vld [vmem:[%s3764_s0] sm:$0xff]  ;;  %s2439_s1 = sshll.u32 %s4390_s15, 5  ;;  %s2095_s21 = sshll.u32 %s4060_s3, 4  ;;  %s4112_s21 = int_to_ptr.vmem [resolvable:$true] %s2095_s21 }
  0xed   : > { %2456 = vmatpush3.bf16.msra.mxu0 %v2947_v15  ;;  %v2964_v33 = vld [vmem:[#allocation10 + $0xb8] sm:$0xff]   ;;  %v537_v34 = vld [vmem:[%s423_s8] sm:$0xff]  ;;  %v505_v39 = vld [vmem:[%s3764_s0 + $0x8] sm:$0xff]  ;;  %521 = vst [vmem:[#allocation2 + $0x28] sm:$0xff] %v504_v36  ;;  %s503_s14 = scvt.s32.f32 %s3897_s11  ;;  %s4085_s19 = sadd.s32 %s2448_s22, %s2439_s1 }
  0xee   : > { %2520 = vmatpush3.bf16.msra.mxu1 %v2948_v16  ;;  %2457 = vmatprep.subr.bf16.mxu0 %v2949_v17  ;;  %v538_v35 = vld [vmem:[%s423_s8 + $0x8] sm:$0xff]  ;;  %v540_v37 = vmul.f32 %v539_v32, %v537_v34  ;;  %522 = vst [vmem:[#allocation2 + $0x30] sm:$0xff] %v505_v39  ;;  %v2965_v40 = vld [vmem:[#allocation10 + $0x140] sm:$0xff]   ;;  %v506_v42 = vld [vmem:[%s3764_s0 + $0x10] sm:$0xff]  ;;  %v3813_v56 = vpack.c.bf16 %v505_v39, %v504_v36  ;;  %s2440_s4 = sshll.u32 %s4085_s19, 7  ;;  %s4391_s20 = sld [smem:[#allocation42_spill]] }
  0xef   : > { %2521 = vmatprep.subr.bf16.mxu1 %v2950_v18  ;;  %v541_v38 = vmul.f32 %v539_v32, %v538_v35  ;;  %v507_v43 = vld [vmem:[%s3764_s0 + $0x18] sm:$0xff]  ;;  %523 = vst [vmem:[#allocation2 + $0x48] sm:$0xff] %v506_v42  ;;  %v3806_v44 = vld [vmem:[%s3764_s0 + $0x20] sm:$0xff]  ;;  %v3809_v45 = vld [vmem:[%s3764_s0 + $0x28] sm:$0xff]  ;;  %s2071_s8 = scalar_lea.sflag [#allocation6], %s3758_s28  ;;  %s3123_s27 = scalar_lea.vmem %s4112_s21, 2048 }
  0xf0   : > { %542 = vst [vmem:[#allocation2 + $0x8] sm:$0xff] %v540_v37  ;;  %524 = vst [vmem:[#allocation2 + $0x50] sm:$0xff] %v507_v43  ;;  %v2970_v47 = vld [vmem:[#allocation10 + $0x1c0] sm:$0xff]   ;;  %v2967_v61 = vld [vmem:[#allocation10 + $0x148] sm:$0xff]   ;;  %v3829_v9 = vpack.c.bf16 %v507_v43, %v506_v42  ;;  %p3124_p13 = scmp.ne.s32.totalorder %s4112_s21, %s3123_s27  ;;  %p4392_p12 = scmp.ne.s32.totalorder %s4361_s23, 0 }
  0xf1   : > { %2458 = vmatpush3.bf16.msra.mxu0 %v2951_v19  ;;  %543 = vst [vmem:[#allocation2 + $0x10] sm:$0xff] %v541_v38  ;;  %v620_v41 = vpack.c.bf16 %v541_v38, %v540_v37  ;;  %525 = vst [vmem:[#allocation2 + $0x68] sm:$0xff] %v3806_v44  ;;  %v2966_v49 = vld [vmem:[#allocation10 + $0x100] sm:$0xff]   ;;  %v2968_v62 = vld [vmem:[#allocation10 + $0x108] sm:$0xff]   ;;  %s3352_s17 = smov [#allocation12]  }
  0xf2   : > { %2522 = vmatpush3.bf16.msra.mxu1 %v2952_v20  ;;  %2459 = vmatprep.subr.bf16.mxu0 %v2953_v21  ;;  %526 = vst [vmem:[#allocation2 + $0x70] sm:$0xff] %v3809_v45  ;;  %v2969_v63 = vld [vmem:[#allocation10 + $0x150] sm:$0xff]   ;;  %v2972_v2 = vld [vmem:[#allocation10 + $0x180] sm:$0xff]   ;;  %v3823_v4 = vld [vmem:[%s3764_s0 + $0x38] sm:$0xff]  ;;  %p3125_p8 = pnand %p3124_p13, %p4392_p12  ;;  %s3127_s13 = sshll.u32 %s3352_s17, 4  ;;  %s3128_s13 = int_to_ptr.vmem [resolvable:$false] %s3127_s13 }
  0xf3   : > { %2523 = vmatprep.subr.bf16.mxu1 %v2954_v22  ;;  %1541 = vmatprep.mubr.bf16.mxu0 %v620_v41  ;;  %v3820_v3 = vld [vmem:[%s3764_s0 + $0x30] sm:$0xff]  ;;  %528 = vst [vmem:[#allocation2 + $0x90] sm:$0xff] %v3823_v4  ;;  %v2974_v10 = vld [vmem:[#allocation10 + $0x1c8] sm:$0xff]   ;;  %v2973_v12 = vld [vmem:[#allocation10 + $0x158] sm:$0xff]   ;;  %p3130_p6 = scmp.lt.s32.totalorder %s4112_s21, %s3128_s13 }
  0xf4   : > { %v668_v46 = vld [vmem:[#allocation2 + $0x27] sm:$0xff]  ;;  %527 = vst [vmem:[#allocation2 + $0x88] sm:$0xff] %v3820_v3  ;;  %v2971_v7 = vld [vmem:[#allocation10 + $0x110] sm:$0xff]   ;;  %v2975_v19 = vld [vmem:[#allocation10 + $0x118] sm:$0xff]   ;;  %v3875_v41 = vpack.c.bf16 %v3823_v4, %v3820_v3  ;;  %s4110_s24 = scalar_lea.hbm %s4391_s20, %s2440_s4  ;;  %p3126_p10 = pneg %p3125_p8 }
  0xf5   : > { %2460 = vmatpush3.bf16.msra.mxu0 %v2955_v23  ;;  %v669_v48 = vld [vmem:[#allocation2 + $0x2f] sm:$0xff]  ;;  %v3834_v14 = vld [vmem:[%s3764_s0 + $0x40] sm:$0xff]  ;;  %v2982_v35 = vld [vmem:[#allocation10 + $0x1d8] sm:$0xff]  }
  0xf6   : > { %2524 = vmatpush3.bf16.msra.mxu1 %v2956_v24  ;;  %2461 = vmatprep.subr.bf16.mxu0 %v2957_v25  ;;  %v684_v50 = vpack.c.bf16 %v669_v48, %v668_v46  ;;  %v670_v57 = vld [vmem:[#allocation2 + $0x47] sm:$0xff]  ;;  %v639_v1 = vld [vmem:[#allocation2 + $0x31] sm:$0xff]  ;;  %529 = vst [vmem:[#allocation2 + $0xa8] sm:$0xff] %v3834_v14  ;;  %v3848_v25 = vpack.c.bf16 %v3809_v45, %v3806_v44 }
  0xf7   : > { %2525 = vmatprep.subr.bf16.mxu1 %v2958_v26  ;;  %v572_v51 = vld [vmem:[#allocation2 + $0x7] sm:$0xff]  ;;  %v671_v58 = vld [vmem:[#allocation2 + $0x4f] sm:$0xff]  ;;  %v2984_v37 = vld [vmem:[#allocation10 + $0x198] sm:$0xff]  }
  0xf8   : > { %v573_v52 = vld [vmem:[#allocation2 + $0xf] sm:$0xff]  ;;  %1638 = vmatprep.mubr.bf16.mxu1 %v684_v50  ;;  %v3815_v60 = vpack.c.bf16 %v671_v58, %v670_v57  ;;  %v672_v5 = vld [vmem:[#allocation2 + $0x67] sm:$0xff] }
  0xf9   : > { %2462 = vmatpush3.bf16.msra.mxu0 %v2959_v27  ;;  %v636_v53 = vld [vmem:[#allocation2 + $0x9] sm:$0xff]  ;;  %v588_v54 = vpack.c.bf16 %v573_v52, %v572_v51  ;;  %v637_v55 = vld [vmem:[#allocation2 + $0x11] sm:$0xff]  ;;  %v2977_v20 = vld [vmem:[#allocation10 + $0x160] sm:$0xff]  }
  0xfa   : > { %2526 = vmatpush3.bf16.msra.mxu1 %v2960_v28  ;;  %2463 = vmatprep.subr.bf16.mxu0 %v2961_v29  ;;  %v652_v59 = vpack.c.bf16 %v637_v55, %v636_v53  ;;  %v638_v0 = vld [vmem:[#allocation2 + $0x29] sm:$0xff]  ;;  %v641_v17 = vld [vmem:[#allocation2 + $0x51] sm:$0xff]  ;;  %v2979_v23 = vld [vmem:[#allocation10 + $0x120] sm:$0xff]  }
  0xfb   : > { %2527 = vmatprep.subr.bf16.mxu1 %v2962_v30  ;;  %v673_v6 = vld [vmem:[#allocation2 + $0x6f] sm:$0xff]  ;;  %v3827_v8 = vpack.c.bf16 %v639_v1, %v638_v0  ;;  %v674_v18 = vld [vmem:[#allocation2 + $0x87] sm:$0xff]  ;;  %v3856_v29 = vld [vmem:[%s3764_s0 + $0x58] sm:$0xff] }
  0xfc   : > { %v3831_v11 = vpack.c.bf16 %v673_v6, %v672_v5  ;;  %v2976_v13 = vld [vmem:[#allocation10 + $0x188] sm:$0xff]   ;;  %v2978_v22 = vld [vmem:[#allocation10 + $0x1d0] sm:$0xff]   ;;  %532 = vst [vmem:[#allocation2 + $0xd0] sm:$0xff] %v3856_v29  ;;  %v3865_v38 = vld [vmem:[%s3764_s0 + $0x60] sm:$0xff] }
  0xfd   : > { %2464 = vmatpush3.bf16.msra.mxu0 %v2963_v31  ;;  %v640_v15 = vld [vmem:[#allocation2 + $0x49] sm:$0xff]  ;;  %v643_v32 = vld [vmem:[#allocation2 + $0x71] sm:$0xff]  ;;  %533 = vst [vmem:[#allocation2 + $0xe8] sm:$0xff] %v3865_v38  ;;  %v2986_v44 = vld [vmem:[#allocation10 + $0x1e0] sm:$0xff]  }
  0xfe   : > { %2528 = vmatpush3.bf16.msra.mxu1 %v2964_v33  ;;  %2577 = vmatprep.subr.bf16.mxu0 %v2965_v40  ;;  %v3837_v16 = vld [vmem:[%s3764_s0 + $0x48] sm:$0xff]  ;;  %v3844_v24 = vpack.c.bf16 %v641_v17, %v640_v15  ;;  %v2980_v26 = vld [vmem:[#allocation10 + $0x190] sm:$0xff]   ;;  %v2993_v1 = vld [vmem:[#allocation10 + $0x138] sm:$0xff]  }
  0xff   : > { %2641 = vmatprep.subr.bf16.mxu1 %v2970_v47  ;;  %530 = vst [vmem:[#allocation2 + $0xb0] sm:$0xff] %v3837_v16  ;;  %v675_v21 = vld [vmem:[#allocation2 + $0x8f] sm:$0xff]  ;;  %v676_v33 = vld [vmem:[#allocation2 + $0xa7] sm:$0xff]  ;;  %v3891_v57 = vpack.c.bf16 %v3837_v16, %v3834_v14  ;;  %v2995_v5 = vld [vmem:[#allocation10 + $0x1f8] sm:$0xff]   ;;  %v546_v16 = vstv %s503_s14 }
 0x100   : > { %1542 = vmatmul.mubr.bf16.vlgmr.msra.gmra.mrb[0].mxu0 %v588_v54  ;;  %v3851_v27 = vld [vmem:[%s3764_s0 + $0x50] sm:$0xff]  ;;  %v3853_v28 = vpack.c.bf16 %v675_v21, %v674_v18  ;;  %v2981_v30 = vld [vmem:[#allocation10 + $0x168] sm:$0xff]   ;;  %v519_v54 = vld [vmem:[%s3764_s0 + $0x78] sm:$0xff] }
 0x101   : > { %1639 = vmatmul.mubr.bf16.vlgmr.msra.gmra.mrb[0].mxu1 %v652_v59  ;;  %2578 = vmatpush3.bf16.msra.mxu0 %v2966_v49  ;;  %531 = vst [vmem:[#allocation2 + $0xc8] sm:$0xff] %v3851_v27  ;;  %v642_v31 = vld [vmem:[#allocation2 + $0x69] sm:$0xff]  ;;  %v645_v46 = vld [vmem:[#allocation2 + $0x91] sm:$0xff]  ;;  %v2988_v49 = vld [vmem:[#allocation10 + $0x1a0] sm:$0xff]  }
 0x102   : > { %1549 = vmatprep.mubr.bf16.mxu0 %v3813_v56  ;;  %1646 = vmatprep.mubr.bf16.mxu1 %v3815_v60  ;;  %v2983_v36 = vld [vmem:[#allocation10 + $0x128] sm:$0xff]   ;;  %v3871_v40 = vpack.c.bf16 %v643_v32, %v642_v31  ;;  %v2985_v42 = vld [vmem:[#allocation10 + $0x170] sm:$0xff]   ;;  %536 = vst [vmem:[#allocation2 + $0x110] sm:$0xff] %v519_v54  ;;  %v2996_v6 = vld [vmem:[#allocation10 + $0x1b8] sm:$0xff]  }
 0x103   : > { %2579 = vmatprep.subr.bf16.mxu0 %v2967_v61  ;;  %2642 = vmatpush3.bf16.msra.mxu1 %v2972_v2  ;;  %v3868_v39 = vld [vmem:[%s3764_s0 + $0x68] sm:$0xff]  ;;  %v2987_v47 = vld [vmem:[#allocation10 + $0x130] sm:$0xff]   ;;  %v2991_v61 = vld [vmem:[#allocation10 + $0x178] sm:$0xff]  }
 0x104   : > { %2643 = vmatprep.subr.bf16.mxu1 %v2974_v10  ;;  %534 = vst [vmem:[#allocation2 + $0xf0] sm:$0xff] %v3868_v39  ;;  %v644_v45 = vld [vmem:[#allocation2 + $0x89] sm:$0xff]  ;;  %v3909_v10 = vpack.c.bf16 %v3856_v29, %v3851_v27  ;;  %v649_v15 = vld [vmem:[#allocation2 + $0xd1] sm:$0xff] }
 0x105   : > { %2580 = vmatpush3.bf16.msra.mxu0 %v2968_v62  ;;  %v2990_v52 = vld [vmem:[#allocation10 + $0x1a8] sm:$0xff]   ;;  %v518_v53 = vld [vmem:[%s3764_s0 + $0x70] sm:$0xff]  ;;  %v3887_v55 = vpack.c.bf16 %v645_v46, %v644_v45 }
 0x106   : > { %2581 = vmatprep.subr.bf16.mxu0 %v2969_v63  ;;  %v677_v34 = vld [vmem:[#allocation2 + $0xaf] sm:$0xff]  ;;  %535 = vst [vmem:[#allocation2 + $0x108] sm:$0xff] %v518_v53  ;;  %v3893_v58 = vpack.c.bf16 %v519_v54, %v518_v53  ;;  %v680_v2 = vld [vmem:[#allocation2 + $0xe7] sm:$0xff] }
 0x107   : > { %2644 = vmatpush3.bf16.msra.mxu1 %v2976_v13  ;;  %v3878_v43 = vpack.c.bf16 %v677_v34, %v676_v33  ;;  %v2992_v62 = vld [vmem:[#allocation10 + $0x1f0] sm:$0xff]   ;;  %v2998_v33 = vld [vmem:[#allocation10 + $0x208] sm:$0xff]  }
 0x108   : > { %1550 = vmatmul.mubr.bf16.gmra.mrb[4].mxu0 %v684_v50  ;;  %2645 = vmatprep.subr.bf16.mxu1 %v2978_v22  ;;  %v678_v48 = vld [vmem:[#allocation2 + $0xc7] sm:$0xff]  ;;  %v679_v51 = vld [vmem:[#allocation2 + $0xcf] sm:$0xff]  ;;  %v3926_v22 = vpack.c.bf16 %v3868_v39, %v3865_v38 }
 0x109   : > { %1647 = vmatmul.mubr.bf16.gmra.mrb[4].mxu1 %v3827_v8  ;;  %1557 = vmatprep.mubr.bf16.mxu0 %v3829_v9  ;;  %v2989_v50 = vld [vmem:[#allocation10 + $0x1e8] sm:$0xff]   ;;  %v3899_v59 = vpack.c.bf16 %v679_v51, %v678_v48  ;;  %v647_v0 = vld [vmem:[#allocation2 + $0xb1] sm:$0xff] }
 0x10a   : > { %1654 = vmatprep.mubr.bf16.mxu1 %v3831_v11  ;;  %2582 = vmatpush3.bf16.msra.mxu0 %v2971_v7  ;;  %v646_v63 = vld [vmem:[#allocation2 + $0xa9] sm:$0xff] }
 0x10b   : > { %2583 = vmatprep.subr.bf16.mxu0 %v2973_v12  ;;  %2646 = vmatpush3.bf16.msra.mxu1 %v2980_v26  ;;  %v681_v3 = vld [vmem:[#allocation2 + $0xef] sm:$0xff]  ;;  %v3905_v7 = vpack.c.bf16 %v647_v0, %v646_v63  ;;  %v2997_v12 = vld [vmem:[#allocation10 + $0x200] sm:$0xff]  }
 0x10c   : > { %2647 = vmatprep.subr.bf16.mxu1 %v2982_v35  ;;  %v2994_v4 = vld [vmem:[#allocation10 + $0x1b0] sm:$0xff]   ;;  %v3911_v13 = vpack.c.bf16 %v681_v3, %v680_v2  ;;  %v3000_v35 = vld [vmem:[#allocation10 + $0x218] sm:$0xff]  }
 0x10d   : > { %v648_v14 = vld [vmem:[#allocation2 + $0xc9] sm:$0xff]  ;;  %v651_v31 = vld [vmem:[#allocation2 + $0xf1] sm:$0xff] }
 0x10e   : > { %2584 = vmatpush3.bf16.msra.mxu0 %v2975_v19  ;;  %v682_v17 = vld [vmem:[#allocation2 + $0x107] sm:$0xff]  ;;  %v683_v18 = vld [vmem:[#allocation2 + $0x10f] sm:$0xff]  ;;  %v3922_v21 = vpack.c.bf16 %v649_v15, %v648_v14 }
 0x10f   : > { %2585 = vmatprep.subr.bf16.mxu0 %v2977_v20  ;;  %2648 = vmatpush3.bf16.msra.mxu1 %v2984_v37  ;;  %v544_v19 = vld [vmem:[%s432_s6] sm:$0xff]  ;;  %v545_v20 = vld [vmem:[%s432_s6 + $0x8] sm:$0xff]  ;;  %v3932_v27 = vpack.c.bf16 %v683_v18, %v682_v17  ;;  %s3129_s6 = scalar_lea.vmem %s3128_s13, 4096 }
 0x110   : > { %1558 = vmatmul.mubr.bf16.gmra.mrb[8].mxu0 %v3815_v60  ;;  %2649 = vmatprep.subr.bf16.mxu1 %v2986_v44  ;;  %v3930_v26 = vmul.f32 %v546_v16, %v545_v20  ;;  %v2999_v34 = vld [vmem:[#allocation10 + $0x210] sm:$0xff]   ;;  %p3131_p2 = scmp.lt.s32.totalorder %s3129_s6, %s3123_s27 }
 0x111   : > { %1655 = vmatmul.mubr.bf16.gmra.mrb[8].mxu1 %v3844_v24  ;;  %1565 = vmatprep.mubr.bf16.mxu0 %v3848_v25 }
 0x112   : > { %1662 = vmatprep.mubr.bf16.mxu1 %v3853_v28  ;;  %2586 = vmatpush3.bf16.msra.mxu0 %v2979_v23  ;;  %v3928_v23 = vmul.f32 %v546_v16, %v544_v19  ;;  %551 = vst [vmem:[#allocation2 + $0x130] sm:$0xff] %v3930_v26  ;;  %p3132_p3 = por %p3131_p2, %p3130_p6 }
 0x113   : > { %2587 = vmatprep.subr.bf16.mxu0 %v2981_v30  ;;  %2650 = vmatpush3.bf16.msra.mxu1 %v2988_v49  ;;  %v650_v30 = vld [vmem:[#allocation2 + $0xe9] sm:$0xff] }
 0x114   : > { %2651 = vmatprep.subr.bf16.mxu1 %v2989_v50  ;;  %550 = vst [vmem:[#allocation2 + $0x128] sm:$0xff] %v3928_v23  ;;  %v820_v29 = vpack.c.bf16 %v3930_v26, %v3928_v23  ;;  %v3942_v32 = vpack.c.bf16 %v651_v31, %v650_v30  ;;  %p3133_p0 = pnand %p3132_p3, %p3126_p10 }
 0x116   : > { %2588 = vmatpush3.bf16.msra.mxu0 %v2983_v36 }
 0x117   : > { %2589 = vmatprep.subr.bf16.mxu0 %v2985_v42  ;;  %2652 = vmatpush3.bf16.msra.mxu1 %v2990_v52 }
 0x118   : > { %1566 = vmatmul.mubr.bf16.gmra.mrb[12].mxu0 %v3831_v11  ;;  %2653 = vmatprep.subr.bf16.mxu1 %v2992_v62 }
 0x119   : > { %1663 = vmatmul.mubr.bf16.gmra.mrb[12].mxu1 %v3871_v40  ;;  %1573 = vmatprep.mubr.bf16.mxu0 %v3875_v41 }
 0x11a   : > { %1670 = vmatprep.mubr.bf16.mxu1 %v3878_v43  ;;  %2590 = vmatpush3.bf16.msra.mxu0 %v2987_v47 }
 0x11b   : > { %2591 = vmatprep.subr.bf16.mxu0 %v2991_v61  ;;  %2654 = vmatpush3.bf16.msra.mxu1 %v2994_v4  ;;  %v779_v36 = vld [vmem:[#allocation2 + $0x127] sm:$0xff]  ;;  %v780_v37 = vld [vmem:[#allocation2 + $0x12f] sm:$0xff] }
 0x11c   : > { %2655 = vmatprep.subr.bf16.mxu1 %v2995_v5  ;;  %v788_v38 = vpack.c.bf16 %v780_v37, %v779_v36  ;;  %v843_v39 = vld [vmem:[#allocation2 + $0x129] sm:$0xff] }
 0x11e   : > { %2592 = vmatpush3.bf16.msra.mxu0 %v2993_v1 }
 0x11f   : > { %2656 = vmatpush3.bf16.msra.mxu1 %v2996_v6  ;;  %2721 = vmatprep.subr.bf16.mxu0 %v2997_v12 }
 0x120   : > { %1574 = vmatmul.mubr.bf16.gmra.mrb[16].mxu0 %v3853_v28  ;;  %2753 = vmatprep.subr.bf16.mxu1 %v2997_v12 }
 0x121   : > { %1671 = vmatmul.mubr.bf16.gmra.mrb[16].mxu1 %v3887_v55  ;;  %1581 = vmatprep.mubr.bf16.mxu0 %v3891_v57 }
 0x122   : > { %1678 = vmatprep.mubr.bf16.mxu1 %v3899_v59 }
 0x128   : > { %1582 = vmatmul.mubr.bf16.gmra.mrb[20].mxu0 %v3878_v43 }
 0x129   : > { %1679 = vmatmul.mubr.bf16.gmra.mrb[20].mxu1 %v3905_v7  ;;  %1589 = vmatprep.mubr.bf16.mxu0 %v3909_v10 }
 0x12a   : > { %1686 = vmatprep.mubr.bf16.mxu1 %v3911_v13 }
 0x130   : > { %1590 = vmatmul.mubr.bf16.gmra.mrb[24].mxu0 %v3899_v59 }
 0x131   : > { %1687 = vmatmul.mubr.bf16.gmra.mrb[24].mxu1 %v3922_v21  ;;  %1597 = vmatprep.mubr.bf16.mxu0 %v3926_v22 }
 0x132   : > { %1694 = vmatprep.mubr.bf16.mxu1 %v3932_v27 }
 0x138   : > { %1598 = vmatmul.mubr.bf16.gmra.mrb[28].mxu0 %v3911_v13 }
 0x139   : > { %1695 = vmatmul.mubr.bf16.gmra.mrb[28].mxu1 %v3942_v32  ;;  %1735 = vmatprep.mubr.bf16.mxu0 %v3827_v8  ;;  %v3003_v8 = vld [vmem:[#allocation10 + $0x230] sm:$0xff]  }
 0x13a   : > { %1832 = vmatprep.mubr.bf16.mxu1 %v3829_v9 }
 0x140   : > { %1736 = vmatmul.mubr.bf16.vlgmr.msra.gmra.mrb[32].mxu0 %v3813_v56  ;;  %v3001_v56 = vld [vmem:[#allocation10 + $0x220] sm:$0xff]  }
 0x141   : > { %1833 = vmatmul.mubr.bf16.vlgmr.msra.gmra.mrb[32].mxu1 %v3815_v60  ;;  %2722 = vmatpush3.bf16.msra.mxu0 %v2997_v12  ;;  %v3002_v60 = vld [vmem:[#allocation10 + $0x228] sm:$0xff]  }
 0x142   : > { %1743 = vmatprep.mubr.bf16.mxu0 %v3844_v24  ;;  %1840 = vmatprep.mubr.bf16.mxu1 %v3848_v25 }
 0x143   : > { %2723 = vmatprep.subr.bf16.mxu0 %v2998_v33  ;;  %2761 = vmatpush3.bf16.msra.mxu1 %v2997_v12 }
 0x144   : > { %2754 = vmatprep.subr.bf16.mxu1 %v2998_v33 }
 0x145   : > { %2724 = vmatpush3.bf16.msra.mxu0 %v2998_v33 }
 0x146   : > { %2725 = vmatprep.subr.bf16.mxu0 %v2999_v34 }
 0x147   : > { %2762 = vmatpush3.bf16.msra.mxu1 %v2998_v33 }
 0x148   : > { %1744 = vmatmul.mubr.bf16.gmra.mrb[36].mxu0 %v3829_v9  ;;  %2755 = vmatprep.subr.bf16.mxu1 %v2999_v34  ;;  %v3004_v9 = vld [vmem:[#allocation10 + $0x238] sm:$0xff]  }
 0x149   : > { %1841 = vmatmul.mubr.bf16.gmra.mrb[36].mxu1 %v3831_v11  ;;  %1751 = vmatprep.mubr.bf16.mxu0 %v3871_v40  ;;  %v746_v11 = vld [vmem:[#allocation2 + $0x109] sm:$0xff] }
 0x14a   : > { %1848 = vmatprep.mubr.bf16.mxu1 %v3875_v41  ;;  %2726 = vmatpush3.bf16.msra.mxu0 %v2999_v34 }
 0x14b   : > { %2727 = vmatprep.subr.bf16.mxu0 %v3000_v35  ;;  %2763 = vmatpush3.bf16.msra.mxu1 %v2999_v34 }
 0x14c   : > { %2756 = vmatprep.subr.bf16.mxu1 %v3000_v35 }
 0x14e   : > { %2728 = vmatpush3.bf16.msra.mxu0 %v3000_v35 }
 0x14f   : > { %2729 = vmatprep.subr.bf16.mxu0 %v3001_v56  ;;  %2764 = vmatpush3.bf16.msra.mxu1 %v3000_v35 }
 0x150   : > { %1752 = vmatmul.mubr.bf16.gmra.mrb[40].mxu0 %v3848_v25  ;;  %2757 = vmatprep.subr.bf16.mxu1 %v3001_v56  ;;  %v747_v25 = vld [vmem:[#allocation2 + $0x111] sm:$0xff] }
 0x151   : > { %1849 = vmatmul.mubr.bf16.gmra.mrb[40].mxu1 %v3853_v28  ;;  %1759 = vmatprep.mubr.bf16.mxu0 %v3887_v55  ;;  %v755_v28 = vpack.c.bf16 %v747_v25, %v746_v11 }
 0x152   : > { %1856 = vmatprep.mubr.bf16.mxu1 %v3891_v57  ;;  %2730 = vmatpush3.bf16.msra.mxu0 %v3001_v56 }
 0x153   : > { %2731 = vmatprep.subr.bf16.mxu0 %v3002_v60  ;;  %2765 = vmatpush3.bf16.msra.mxu1 %v3001_v56 }
 0x154   : > { %2758 = vmatprep.subr.bf16.mxu1 %v3002_v60 }
 0x156   : > { %2732 = vmatpush3.bf16.msra.mxu0 %v3002_v60 }
 0x157   : > { %2733 = vmatprep.subr.bf16.mxu0 %v3003_v8  ;;  %2766 = vmatpush3.bf16.msra.mxu1 %v3002_v60 }
 0x158   : > { %1760 = vmatmul.mubr.bf16.gmra.mrb[44].mxu0 %v3875_v41  ;;  %2759 = vmatprep.subr.bf16.mxu1 %v3003_v8  ;;  %v844_v41 = vld [vmem:[#allocation2 + $0x131] sm:$0xff] }
 0x159   : > { %1857 = vmatmul.mubr.bf16.gmra.mrb[44].mxu1 %v3878_v43  ;;  %1767 = vmatprep.mubr.bf16.mxu0 %v3905_v7  ;;  %v852_v42 = vpack.c.bf16 %v844_v41, %v843_v39 }
 0x15a   : > { %1864 = vmatprep.mubr.bf16.mxu1 %v3909_v10  ;;  %2734 = vmatpush3.bf16.msra.mxu0 %v3003_v8 }
 0x15b   : > { %2735 = vmatprep.subr.bf16.mxu0 %v3004_v9  ;;  %2767 = vmatpush3.bf16.msra.mxu1 %v3003_v8 }
 0x15c   : > { %2760 = vmatprep.subr.bf16.mxu1 %v3004_v9 }
 0x15e   : > { %2736 = vmatpush3.bf16.msra.mxu0 %v3004_v9 }
 0x15f   : > { %2768 = vmatpush3.bf16.msra.mxu1 %v3004_v9 }
 0x160   : > { %1768 = vmatmul.mubr.bf16.gmra.mrb[48].mxu0 %v3891_v57 }
 0x161   : > { %1865 = vmatmul.mubr.bf16.gmra.mrb[48].mxu1 %v3899_v59  ;;  %1775 = vmatprep.mubr.bf16.mxu0 %v3922_v21 }
 0x162   : > { %1872 = vmatprep.mubr.bf16.mxu1 %v3926_v22 }
 0x168   : > { %1776 = vmatmul.mubr.bf16.gmra.mrb[52].mxu0 %v3909_v10 }
 0x169   : > { %1873 = vmatmul.mubr.bf16.gmra.mrb[52].mxu1 %v3911_v13  ;;  %1783 = vmatprep.mubr.bf16.mxu0 %v3942_v32 }
 0x16a   : > { %1880 = vmatprep.mubr.bf16.mxu1 %v3893_v58 }
 0x170   : > { %1784 = vmatmul.mubr.bf16.gmra.mrb[56].mxu0 %v3926_v22 }
 0x171   : > { %1881 = vmatmul.mubr.bf16.gmra.mrb[56].mxu1 %v3932_v27  ;;  %1791 = vmatprep.mubr.bf16.mxu0 %v755_v28 }
 0x172   : > { %1888 = vmatprep.mubr.bf16.mxu1 %v820_v29 }
 0x178   : > { %1792 = vmatmul.mubr.bf16.gmra.mrb[60].mxu0 %v3893_v58 }
 0x179   : > { %1889 = vmatmul.mubr.bf16.gmra.mrb[60].mxu1 %v788_v38  ;;  %2737 = vmatprep.mubr.bf16.mxu0 %v3844_v24 }
 0x17a   : > { %2745 = vmatprep.mubr.bf16.mxu1 %v3922_v21 }
 0x180   : > { %2738 = vmatmul.mubr.bf16.vlgmr.msra.gmra.mrb[64].mxu0 %v3871_v40 }
 0x181   : > { %2746 = vmatmul.mubr.bf16.vlgmr.msra.gmra.mrb[64].mxu1 %v3942_v32  ;;  %2741 = vmatprep.mubr.bf16.mxu0 %v3887_v55 }
 0x182   : > { %2749 = vmatprep.mubr.bf16.mxu1 %v755_v28 }
 0x188   : > { %2742 = vmatmul.mubr.bf16.gmra.mrb[68].mxu0 %v3905_v7 }
 0x189   : > { %2750 = vmatmul.mubr.bf16.gmra.mrb[68].mxu1 %v852_v42 }
 0x1d3   : > { %v2465_v43 = vpop.f32.mrb[0].mxu0 }
 0x1d4   : > { %v2529_v44 = vpop.f32.mrb[0].mxu1  ;;  %v2466_v45 = vpop.f32.mrb[1].mxu0 }
 0x1d5   : > { %v2467_v46 = vadd.f32 %v2466_v45, %v2465_v43  ;;  %v2530_v24 = vpop.f32.mrb[1].mxu1  ;;  %v2468_v47 = vpop.f32.mrb[2].mxu0 }
 0x1d6   : > { %v2531_v48 = vadd.f32 %v2530_v24, %v2529_v44  ;;  %v2532_v49 = vpop.f32.mrb[2].mxu1  ;;  %v2469_v40 = vpop.f32.mrb[3].mxu0 }
 0x1d7   : > { %v2470_v50 = vadd.f32 %v2469_v40, %v2468_v47  ;;  %v2533_v51 = vpop.f32.mrb[3].mxu1 }
 0x1d8   : > { %v3984_v52 = vadd.f32 %v2531_v48, %v2467_v46  ;;  %v2534_v53 = vadd.f32 %v2533_v51, %v2532_v49 }
 0x1da   : > { %v3986_v54 = vadd.f32 %v2534_v53, %v2470_v50 }
 0x1db   : > { %v2471_v55 = vpop.f32.mrb[4].mxu0 }
 0x1dc   : > { %v2535_v57 = vpop.f32.mrb[4].mxu1  ;;  %v2472_v58 = vpop.f32.mrb[5].mxu0 }
 0x1dd   : > { %v2473_v59 = vadd.f32 %v2472_v58, %v2471_v55  ;;  %v2536_v61 = vpop.f32.mrb[5].mxu1  ;;  %v2474_v62 = vpop.f32.mrb[6].mxu0 }
 0x1de   : > { %v2537_v63 = vadd.f32 %v2536_v61, %v2535_v57  ;;  %v2538_v0 = vpop.f32.mrb[6].mxu1  ;;  %v2475_v1 = vpop.f32.mrb[7].mxu0 }
 0x1df   : > { %v2476_v2 = vadd.f32 %v2475_v1, %v2474_v62  ;;  %v2539_v3 = vpop.f32.mrb[7].mxu1 }
 0x1e0   : > { %v3988_v4 = vadd.f32 %v2537_v63, %v2473_v59  ;;  %v2540_v5 = vadd.f32 %v2539_v3, %v2538_v0 }
 0x1e2   : > { %v3990_v6 = vadd.f32 %v2540_v5, %v2476_v2 }
 0x1e3   : > { %v2477_v7 = vpop.f32.mrb[8].mxu0 }
 0x1e4   : > { %v2541_v10 = vpop.f32.mrb[8].mxu1  ;;  %v2478_v12 = vpop.f32.mrb[9].mxu0 }
 0x1e5   : > { %v2479_v13 = vadd.f32 %v2478_v12, %v2477_v7  ;;  %v2542_v14 = vpop.f32.mrb[9].mxu1  ;;  %v2480_v15 = vpop.f32.mrb[10].mxu0 }
 0x1e6   : > { %v2543_v16 = vadd.f32 %v2542_v14, %v2541_v10  ;;  %v2544_v17 = vpop.f32.mrb[10].mxu1  ;;  %v2481_v18 = vpop.f32.mrb[11].mxu0 }
 0x1e7   : > { %v2482_v19 = vadd.f32 %v2481_v18, %v2480_v15  ;;  %v2545_v20 = vpop.f32.mrb[11].mxu1 }
 0x1e8   : > { %v3992_v21 = vadd.f32 %v2543_v16, %v2479_v13  ;;  %v2546_v22 = vadd.f32 %v2545_v20, %v2544_v17 }
 0x1ea   : > { %v3994_v23 = vadd.f32 %v2546_v22, %v2482_v19 }
 0x1eb   : > { %v2483_v26 = vpop.f32.mrb[12].mxu0 }
 0x1ec   : > { %v2547_v27 = vpop.f32.mrb[12].mxu1  ;;  %v2484_v29 = vpop.f32.mrb[13].mxu0 }
 0x1ed   : > { %v2485_v30 = vadd.f32 %v2484_v29, %v2483_v26  ;;  %v2548_v31 = vpop.f32.mrb[13].mxu1  ;;  %v2486_v32 = vpop.f32.mrb[14].mxu0 }
 0x1ee   : > { %v2549_v33 = vadd.f32 %v2548_v31, %v2547_v27  ;;  %v2550_v34 = vpop.f32.mrb[14].mxu1  ;;  %v2487_v35 = vpop.f32.mrb[15].mxu0 }
 0x1ef   : > { %v2488_v56 = vadd.f32 %v2487_v35, %v2486_v32  ;;  %v2551_v60 = vpop.f32.mrb[15].mxu1 }
 0x1f0   : > { %v3996_v8 = vadd.f32 %v2549_v33, %v2485_v30  ;;  %v2552_v9 = vadd.f32 %v2551_v60, %v2550_v34 }
 0x1f2   : > { %v3998_v11 = vadd.f32 %v2552_v9, %v2488_v56 }
 0x1f3   : > { %v2489_v25 = vpop.f32.mrb[16].mxu0 }
 0x1f4   : > { %v2553_v28 = vpop.f32.mrb[16].mxu1  ;;  %v2490_v36 = vpop.f32.mrb[17].mxu0 }
 0x1f5   : > { %v2491_v37 = vadd.f32 %v2490_v36, %v2489_v25  ;;  %v2554_v38 = vpop.f32.mrb[17].mxu1  ;;  %v2492_v39 = vpop.f32.mrb[18].mxu0 }
 0x1f6   : > { %v2555_v41 = vadd.f32 %v2554_v38, %v2553_v28  ;;  %v2556_v42 = vpop.f32.mrb[18].mxu1  ;;  %v2493_v43 = vpop.f32.mrb[19].mxu0 }
 0x1f7   : > { %v2494_v44 = vadd.f32 %v2493_v43, %v2492_v39  ;;  %v2557_v45 = vpop.f32.mrb[19].mxu1 }
 0x1f8   : > { %v4000_v46 = vadd.f32 %v2555_v41, %v2491_v37  ;;  %v2558_v24 = vadd.f32 %v2557_v45, %v2556_v42 }
 0x1fa   : > { %v4002_v47 = vadd.f32 %v2558_v24, %v2494_v44 }
 0x1fb   : > { %v2495_v48 = vpop.f32.mrb[20].mxu0 }
 0x1fc   : > { %v2559_v49 = vpop.f32.mrb[20].mxu1  ;;  %v2496_v40 = vpop.f32.mrb[21].mxu0 }
 0x1fd   : > { %v2497_v50 = vadd.f32 %v2496_v40, %v2495_v48  ;;  %v2560_v51 = vpop.f32.mrb[21].mxu1  ;;  %v2498_v53 = vpop.f32.mrb[22].mxu0 }
 0x1fe   : > { %v2561_v55 = vadd.f32 %v2560_v51, %v2559_v49  ;;  %v2562_v57 = vpop.f32.mrb[22].mxu1  ;;  %v2499_v58 = vpop.f32.mrb[23].mxu0 }
 0x1ff   : > { %v2500_v59 = vadd.f32 %v2499_v58, %v2498_v53  ;;  %v2563_v61 = vpop.f32.mrb[23].mxu1 }
 0x200   : > { %v4004_v62 = vadd.f32 %v2561_v55, %v2497_v50  ;;  %v2564_v63 = vadd.f32 %v2563_v61, %v2562_v57 }
 0x202   : > { %v4006_v0 = vadd.f32 %v2564_v63, %v2500_v59 }
 0x203   : > { %v2501_v1 = vpop.f32.mrb[24].mxu0 }
 0x204   : > { %v2565_v2 = vpop.f32.mrb[24].mxu1  ;;  %v2502_v3 = vpop.f32.mrb[25].mxu0 }
 0x205   : > { %v2503_v5 = vadd.f32 %v2502_v3, %v2501_v1  ;;  %v2566_v7 = vpop.f32.mrb[25].mxu1  ;;  %v2504_v10 = vpop.f32.mrb[26].mxu0 }
 0x206   : > { %v2567_v12 = vadd.f32 %v2566_v7, %v2565_v2  ;;  %v2568_v13 = vpop.f32.mrb[26].mxu1  ;;  %v2505_v14 = vpop.f32.mrb[27].mxu0 }
 0x207   : > { %v2506_v15 = vadd.f32 %v2505_v14, %v2504_v10  ;;  %v2569_v16 = vpop.f32.mrb[27].mxu1 }
 0x208   : > { %v4008_v17 = vadd.f32 %v2567_v12, %v2503_v5  ;;  %v2570_v18 = vadd.f32 %v2569_v16, %v2568_v13 }
 0x20a   : > { %v4010_v19 = vadd.f32 %v2570_v18, %v2506_v15 }
 0x20b   : > { %v2507_v20 = vpop.f32.mrb[28].mxu0 }
 0x20c   : > { %v2571_v22 = vpop.f32.mrb[28].mxu1  ;;  %v2508_v26 = vpop.f32.mrb[29].mxu0 }
 0x20d   : > { %v2509_v27 = vadd.f32 %v2508_v26, %v2507_v20  ;;  %v2572_v29 = vpop.f32.mrb[29].mxu1  ;;  %v2510_v30 = vpop.f32.mrb[30].mxu0 }
 0x20e   : > { %v2573_v31 = vadd.f32 %v2572_v29, %v2571_v22  ;;  %v2574_v32 = vpop.f32.mrb[30].mxu1  ;;  %v2511_v33 = vpop.f32.mrb[31].mxu0 }
 0x20f   : > { %v2512_v34 = vadd.f32 %v2511_v33, %v2510_v30  ;;  %v2575_v35 = vpop.f32.mrb[31].mxu1 }
 0x210   : > { %v4012_v56 = vadd.f32 %v2573_v31, %v2509_v27  ;;  %v2576_v60 = vadd.f32 %v2575_v35, %v2574_v32 }
 0x212   : > { %v4014_v9 = vadd.f32 %v2576_v60, %v2512_v34 }
 0x213   : > { %v2593_v25 = vpop.f32.mrb[32].mxu0 }
 0x214   : > { %v2594_v28 = vpop.f32.mrb[33].mxu0  ;;  %v2657_v36 = vpop.f32.mrb[32].mxu1 }
 0x215   : > { %v2595_v37 = vadd.f32 %v2594_v28, %v2593_v25  ;;  %v2596_v38 = vpop.f32.mrb[34].mxu0  ;;  %v2658_v39 = vpop.f32.mrb[33].mxu1 }
 0x216   : > { %v2597_v41 = vpop.f32.mrb[35].mxu0  ;;  %v2659_v42 = vadd.f32 %v2658_v39, %v2657_v36  ;;  %v2660_v43 = vpop.f32.mrb[34].mxu1 }
 0x217   : > { %v1738_v44 = vadd.f32 %v2595_v37, %v3984_v52  ;;  %v2598_v45 = vadd.f32 %v2597_v41, %v2596_v38  ;;  %v2661_v24 = vpop.f32.mrb[35].mxu1 }
 0x218   : > { %v2662_v48 = vadd.f32 %v2661_v24, %v2660_v43 }
 0x219   : > { %v1741_v49 = vadd.f32 %v2598_v45, %v3986_v54  ;;  %v4018_v40 = vadd.f32 %v2659_v42, %v1738_v44 }
 0x21b   : > { %v2599_v50 = vpop.f32.mrb[36].mxu0  ;;  %v4020_v51 = vadd.f32 %v2662_v48, %v1741_v49 }
 0x21c   : > { %v2600_v53 = vpop.f32.mrb[37].mxu0  ;;  %v2663_v55 = vpop.f32.mrb[36].mxu1 }
 0x21d   : > { %v2601_v57 = vadd.f32 %v2600_v53, %v2599_v50  ;;  %v2602_v58 = vpop.f32.mrb[38].mxu0  ;;  %v2664_v59 = vpop.f32.mrb[37].mxu1 }
 0x21e   : > { %v2603_v61 = vpop.f32.mrb[39].mxu0  ;;  %v2665_v63 = vadd.f32 %v2664_v59, %v2663_v55  ;;  %v2666_v1 = vpop.f32.mrb[38].mxu1 }
 0x21f   : > { %v1746_v52 = vadd.f32 %v2601_v57, %v3988_v4  ;;  %v2604_v2 = vadd.f32 %v2603_v61, %v2602_v58  ;;  %v2667_v3 = vpop.f32.mrb[39].mxu1 }
 0x220   : > { %v2668_v5 = vadd.f32 %v2667_v3, %v2666_v1 }
 0x221   : > { %v1749_v54 = vadd.f32 %v2604_v2, %v3990_v6  ;;  %v4024_v7 = vadd.f32 %v2665_v63, %v1746_v52 }
 0x223   : > { %v2605_v10 = vpop.f32.mrb[40].mxu0  ;;  %v4026_v12 = vadd.f32 %v2668_v5, %v1749_v54 }
 0x224   : > { %v2606_v13 = vpop.f32.mrb[41].mxu0  ;;  %v2669_v14 = vpop.f32.mrb[40].mxu1 }
 0x225   : > { %v2607_v15 = vadd.f32 %v2606_v13, %v2605_v10  ;;  %v2608_v16 = vpop.f32.mrb[42].mxu0  ;;  %v2670_v18 = vpop.f32.mrb[41].mxu1 }
 0x226   : > { %v2609_v20 = vpop.f32.mrb[43].mxu0  ;;  %v2671_v22 = vadd.f32 %v2670_v18, %v2669_v14  ;;  %v2672_v26 = vpop.f32.mrb[42].mxu1 }
 0x227   : > { %v1754_v4 = vadd.f32 %v2607_v15, %v3992_v21  ;;  %v2610_v27 = vadd.f32 %v2609_v20, %v2608_v16  ;;  %v2673_v29 = vpop.f32.mrb[43].mxu1 }
 0x228   : > { %v2674_v30 = vadd.f32 %v2673_v29, %v2672_v26 }
 0x229   : > { %v1757_v6 = vadd.f32 %v2610_v27, %v3994_v23  ;;  %v4030_v31 = vadd.f32 %v2671_v22, %v1754_v4 }
 0x22b   : > { %v2611_v32 = vpop.f32.mrb[44].mxu0  ;;  %v4032_v33 = vadd.f32 %v2674_v30, %v1757_v6 }
 0x22c   : > { %v2612_v34 = vpop.f32.mrb[45].mxu0  ;;  %v2675_v35 = vpop.f32.mrb[44].mxu1 }
 0x22d   : > { %v2613_v60 = vadd.f32 %v2612_v34, %v2611_v32  ;;  %v2614_v25 = vpop.f32.mrb[46].mxu0  ;;  %v2676_v28 = vpop.f32.mrb[45].mxu1 }
 0x22e   : > { %v2615_v36 = vpop.f32.mrb[47].mxu0  ;;  %v2677_v37 = vadd.f32 %v2676_v28, %v2675_v35  ;;  %v2678_v38 = vpop.f32.mrb[46].mxu1 }
 0x22f   : > { %v1762_v21 = vadd.f32 %v2613_v60, %v3996_v8  ;;  %v2616_v39 = vadd.f32 %v2615_v36, %v2614_v25  ;;  %v2679_v41 = vpop.f32.mrb[47].mxu1 }
 0x230   : > { %v2680_v42 = vadd.f32 %v2679_v41, %v2678_v38 }
 0x231   : > { %v1765_v23 = vadd.f32 %v2616_v39, %v3998_v11  ;;  %v4036_v43 = vadd.f32 %v2677_v37, %v1762_v21 }
 0x233   : > { %v2617_v44 = vpop.f32.mrb[48].mxu0  ;;  %v4038_v45 = vadd.f32 %v2680_v42, %v1765_v23 }
 0x234   : > { %v2618_v24 = vpop.f32.mrb[49].mxu0  ;;  %v2681_v48 = vpop.f32.mrb[48].mxu1 }
 0x235   : > { %v2619_v49 = vadd.f32 %v2618_v24, %v2617_v44  ;;  %v2620_v50 = vpop.f32.mrb[50].mxu0  ;;  %v2682_v53 = vpop.f32.mrb[49].mxu1 }
 0x236   : > { %v2621_v55 = vpop.f32.mrb[51].mxu0  ;;  %v2683_v57 = vadd.f32 %v2682_v53, %v2681_v48  ;;  %v2684_v58 = vpop.f32.mrb[50].mxu1 }
 0x237   : > { %v1770_v8 = vadd.f32 %v2619_v49, %v4000_v46  ;;  %v2622_v59 = vadd.f32 %v2621_v55, %v2620_v50  ;;  %v2685_v61 = vpop.f32.mrb[51].mxu1 }
 0x238   : > { %v2686_v63 = vadd.f32 %v2685_v61, %v2684_v58 }
 0x239   : > { %v1773_v11 = vadd.f32 %v2622_v59, %v4002_v47  ;;  %v1867_v1 = vadd.f32 %v2683_v57, %v1770_v8 }
 0x23b   : > { %v2623_v52 = vpop.f32.mrb[52].mxu0  ;;  %v4042_v2 = vadd.f32 %v2686_v63, %v1773_v11 }
 0x23c   : > { %v2624_v3 = vpop.f32.mrb[53].mxu0  ;;  %v2687_v5 = vpop.f32.mrb[52].mxu1 }
 0x23d   : > { %v2625_v54 = vadd.f32 %v2624_v3, %v2623_v52  ;;  %v2626_v10 = vpop.f32.mrb[54].mxu0  ;;  %v2688_v13 = vpop.f32.mrb[53].mxu1 }
 0x23e   : > { %v2627_v14 = vpop.f32.mrb[55].mxu0  ;;  %v2689_v15 = vadd.f32 %v2688_v13, %v2687_v5  ;;  %v2690_v16 = vpop.f32.mrb[54].mxu1 }
 0x23f   : > { %v1778_v18 = vadd.f32 %v2625_v54, %v4004_v62  ;;  %v2628_v46 = vadd.f32 %v2627_v14, %v2626_v10  ;;  %v2691_v20 = vpop.f32.mrb[55].mxu1 }
 0x240   : > { %v2692_v22 = vadd.f32 %v2691_v20, %v2690_v16 }
 0x241   : > { %v1781_v26 = vadd.f32 %v2628_v46, %v4006_v0  ;;  %v1875_v47 = vadd.f32 %v2689_v15, %v1778_v18 }
 0x243   : > { %v2629_v4 = vpop.f32.mrb[56].mxu0  ;;  %v1878_v27 = vadd.f32 %v2692_v22, %v1781_v26 }
 0x244   : > { %v2630_v29 = vpop.f32.mrb[57].mxu0  ;;  %v2693_v30 = vpop.f32.mrb[56].mxu1 }
 0x245   : > { %v2631_v6 = vadd.f32 %v2630_v29, %v2629_v4  ;;  %v2632_v32 = vpop.f32.mrb[58].mxu0  ;;  %v2694_v34 = vpop.f32.mrb[57].mxu1 }
 0x246   : > { %v2633_v35 = vpop.f32.mrb[59].mxu0  ;;  %v2695_v60 = vadd.f32 %v2694_v34, %v2693_v30  ;;  %v2696_v25 = vpop.f32.mrb[58].mxu1 }
 0x247   : > { %v1786_v28 = vadd.f32 %v2631_v6, %v4008_v17  ;;  %v2634_v36 = vadd.f32 %v2633_v35, %v2632_v32  ;;  %v2697_v62 = vpop.f32.mrb[59].mxu1 }
 0x248   : > { %v2698_v37 = vadd.f32 %v2697_v62, %v2696_v25 }
 0x249   : > { %v1789_v38 = vadd.f32 %v2634_v36, %v4010_v19  ;;  %v4048_v21 = vadd.f32 %v2695_v60, %v1786_v28 }
 0x24b   : > { %v2635_v0 = vpop.f32.mrb[60].mxu0  ;;  %v4050_v39 = vadd.f32 %v2698_v37, %v1789_v38 }
 0x24c   : > { %v2636_v41 = vpop.f32.mrb[61].mxu0  ;;  %v2699_v42 = vpop.f32.mrb[60].mxu1 }
 0x24d   : > { %v2637_v23 = vadd.f32 %v2636_v41, %v2635_v0  ;;  %v2638_v44 = vpop.f32.mrb[62].mxu0  ;;  %v2700_v24 = vpop.f32.mrb[61].mxu1 }
 0x24e   : > { %v2639_v48 = vpop.f32.mrb[63].mxu0  ;;  %v2701_v49 = vadd.f32 %v2700_v24, %v2699_v42  ;;  %v2702_v50 = vpop.f32.mrb[62].mxu1 }
 0x24f   : > { %v1794_v17 = vadd.f32 %v2637_v23, %v4012_v56  ;;  %v2640_v53 = vadd.f32 %v2639_v48, %v2638_v44  ;;  %v2703_v55 = vpop.f32.mrb[63].mxu1 }
 0x250   : > { %v2704_v57 = vadd.f32 %v2703_v55, %v2702_v50 }
 0x251   : > { %v1797_v19 = vadd.f32 %v2640_v53, %v4014_v9  ;;  %v1891_v58 = vadd.f32 %v2701_v49, %v1794_v17 }
 0x253   : > { %v2739_v8 = vpop.f32.mrb[64].mxu0  ;;  %v1894_v59 = vadd.f32 %v2704_v57, %v1797_v19 }
 0x254   : > { %v1940_v61 = vadd.f32 %v2739_v8, %v4024_v7  ;;  %v2747_v63 = vpop.f32.mrb[64].mxu1  ;;  %v1931_v11 = vpop.f32.mrb[65].mxu0 }
 0x255   : > { %v4055_v52 = vadd.f32 %v2747_v63, %v1875_v47  ;;  %v1932_v3 = vadd.f32 %v1931_v11, %v4018_v40  ;;  %v1963_v5 = vpop.f32.mrb[65].mxu1  ;;  %v2740_v56 = vpop.f32.mrb[66].mxu0 }
 0x256   : > { %1996 = vst [vmem:[%s4060_s3 + $0x10] sm:$0xff] %v1940_v61  ;;  %v4063_v9 = vadd.f32 %v1963_v5, %v1867_v1  ;;  %v1943_v7 = vadd.f32 %v2740_v56, %v4026_v12  ;;  %v2748_v54 = vpop.f32.mrb[66].mxu1  ;;  %v1934_v10 = vpop.f32.mrb[67].mxu0 }
 0x257   : > { %2004 = vst [vmem:[%s4060_s3 + $0x50] sm:$0xff] %v4055_v52  ;;  %1994 = vst [vmem:[%s4060_s3] sm:$0xff] %v1932_v3  ;;  %v4069_v40 = vadd.f32 %v2748_v54, %v1878_v27  ;;  %v1935_v13 = vadd.f32 %v1934_v10, %v4020_v51  ;;  %v1966_v14 = vpop.f32.mrb[67].mxu1  ;;  %v2032_v12 = vmul.f32 %v1932_v3, %v1932_v3 }
 0x258   : > { %2002 = vst [vmem:[%s4060_s3 + $0x40] sm:$0xff] %v4063_v9  ;;  %1997 = vst [vmem:[%s4060_s3 + $0x18] sm:$0xff] %v1943_v7  ;;  %v4078_v1 = vadd.f32 %v1966_v14, %v4042_v2  ;;  %v2034_v51 = vmul.f32 %v1940_v61, %v1940_v61  ;;  %v2035_v22 = vmul.f32 %v1943_v7, %v1943_v7 }
 0x259   : > { %2005 = vst [vmem:[%s4060_s3 + $0x58] sm:$0xff] %v4069_v40  ;;  %1995 = vst [vmem:[%s4060_s3 + $0x8] sm:$0xff] %v1935_v13  ;;  %v2010_v15 = vadd.f32 %v1935_v13, %v1932_v3  ;;  %v2033_v16 = vmul.f32 %v1935_v13, %v1935_v13 }
 0x25a   : > { %2003 = vst [vmem:[%s4060_s3 + $0x48] sm:$0xff] %v4078_v1 }
 0x25b   : > { %v2011_v18 = vadd.f32 %v2010_v15, %v1940_v61  ;;  %v2048_v46 = vadd.f32 %v2033_v16, %v2032_v12  ;;  %v2743_v20 = vpop.f32.mrb[68].mxu0 }
 0x25c   : > { %v1956_v2 = vadd.f32 %v2743_v20, %v4036_v43  ;;  %v2751_v26 = vpop.f32.mrb[68].mxu1  ;;  %v1947_v47 = vpop.f32.mrb[69].mxu0 }
 0x25d   : > { %v2049_v4 = vadd.f32 %v2048_v46, %v2034_v51  ;;  %v4088_v27 = vadd.f32 %v2751_v26, %v1891_v58  ;;  %v1948_v29 = vadd.f32 %v1947_v47, %v4030_v31  ;;  %v2012_v30 = vadd.f32 %v2011_v18, %v1943_v7  ;;  %v1979_v6 = vpop.f32.mrb[69].mxu1  ;;  %v2744_v32 = vpop.f32.mrb[70].mxu0 }
 0x25e   : > { %2000 = vst [vmem:[%s4060_s3 + $0x30] sm:$0xff] %v1956_v2  ;;  %v4095_v34 = vadd.f32 %v1979_v6, %v4048_v21  ;;  %v1959_v43 = vadd.f32 %v2744_v32, %v4038_v45  ;;  %v2752_v35 = vpop.f32.mrb[70].mxu1  ;;  %v1950_v60 = vpop.f32.mrb[71].mxu0 }
 0x25f   : > { %2008 = vst [vmem:[%s4060_s3 + $0x70] sm:$0xff] %v4088_v27  ;;  %1998 = vst [vmem:[%s4060_s3 + $0x20] sm:$0xff] %v1948_v29  ;;  %v2013_v31 = vadd.f32 %v2012_v30, %v1948_v29  ;;  %v2036_v25 = vmul.f32 %v1948_v29, %v1948_v29  ;;  %v2050_v28 = vadd.f32 %v2049_v4, %v2035_v22  ;;  %v1982_v36 = vpop.f32.mrb[71].mxu1 }
 0x260   : > { %2006 = vst [vmem:[%s4060_s3 + $0x60] sm:$0xff] %v4095_v34  ;;  %2001 = vst [vmem:[%s4060_s3 + $0x38] sm:$0xff] %v1959_v43  ;;  %v4104_v62 = vadd.f32 %v2752_v35, %v1894_v59  ;;  %v1951_v45 = vadd.f32 %v1950_v60, %v4032_v33  ;;  %v1983_v38 = vadd.f32 %v1982_v36, %v4050_v39 }
 0x261   : > { %v2051_v37 = vadd.f32 %v2050_v28, %v2036_v25  ;;  %v2038_v33 = vmul.f32 %v1956_v2, %v1956_v2 }
 0x262   : > { %2009 = vst [vmem:[%s4060_s3 + $0x78] sm:$0xff] %v4104_v62  ;;  %1999 = vst [vmem:[%s4060_s3 + $0x28] sm:$0xff] %v1951_v45  ;;  %v2014_v21 = vadd.f32 %v2013_v31, %v1951_v45  ;;  %v2037_v0 = vmul.f32 %v1951_v45, %v1951_v45 }
 0x263   : > { %2007 = vst [vmem:[%s4060_s3 + $0x68] sm:$0xff] %v1983_v38 }
 0x264   : > { %v2015_v41 = vadd.f32 %v2014_v21, %v1956_v2  ;;  %v2052_v42 = vadd.f32 %v2051_v37, %v2037_v0 }
 0x265   : > { %3136 = shalt.err (!%p3133_p0)
}
 0x266   : > { %s3137_s25 = scalar_lea.hbm %s4110_s24, 2048  ;;  %s3141_s14 = scalar_lea.hbm %s4391_s20, 8192 }
 0x267   : > { %p3138_p9 = scmp.ne.s32.totalorder %s4110_s24, %s3137_s25  ;;  %p3142_p11 = scmp.lt.u32.totalorder %s4110_s24, %s4391_s20 }
 0x268   : > { %p3143_p7 = scmp.lt.u32.totalorder %s3141_s14, %s3137_s25  ;;  %p3145_p13 = scmp.lt.u32.totalorder %s3137_s25, %s4110_s24 }
 0x269   : > { %p3139_p5 = pnand %p3138_p9, %p4392_p12 }
 0x26a   : > { %p3144_p1 = por %p3143_p7, %p3142_p11 }
 0x26b   : > { %p3140_p4 = pneg %p3139_p5 }
 0x26c   : > { %p3146_p8 = por %p3145_p13, %p3144_p1 }
 0x26e   : > { %p3147_p10 = pnand %p3146_p8, %p3140_p4 }
 0x270   : > { %3150 = shalt.err (!%p3147_p10)
}
 0x271   : > { %s3353_s1 = smov 128   ;;  %s3354_s19 = smov 8   ;;  %v2039_v39 = vmul.f32 %v1959_v43, %v1959_v43  ;;  %v2016_v23 = vadd.f32 %v2015_v41, %v1959_v43  ;;  %v2053_v44 = vadd.f32 %v2052_v42, %v2038_v33  ;;  %v2040_v24 = vmul.f32 %v4063_v9, %v4063_v9 }
 0x272   : > { %2779 = dma.vmem_to_hbm [thread:$0]  (%p4392_p12), %s4112_s21, 2048, %s4110_s24, %s2071_s8, %s3353_s1, %s3353_s1, %s3354_s19   ;;  %v2041_v50 = vmul.f32 %v4078_v1, %v4078_v1  ;;  %v2042_v55 = vmul.f32 %v4055_v52, %v4055_v52  ;;  %v2043_v58 = vmul.f32 %v4069_v40, %v4069_v40  ;;  %v2044_v61 = vmul.f32 %v4095_v34, %v4095_v34 }
 0x273   : > { %v2017_v48 = vadd.f32 %v2016_v23, %v4063_v9  ;;  %v2054_v49 = vadd.f32 %v2053_v44, %v2039_v39  ;;  %v2045_v5 = vmul.f32 %v1983_v38, %v1983_v38  ;;  %v2047_v54 = vmul.f32 %v4104_v62, %v4104_v62  ;;  %s2441_s4 = sshll.u32 %s4390_s15, 1  ;;  %s480_s7 = scalar_lea.vmem [#allocation13], %s3758_s28 }
 0x274   : > { %s2109_s21 = sadd.s32 %s4389_s18, %s2441_s4  ;;  %s2113_s24 = sshll.u32 %s480_s7, 4  ;;  %s4175_s24 = int_to_ptr.vmem [resolvable:$true] %s2113_s24 }
 0x275   : > { %v2055_v17 = vadd.f32 %v2054_v49, %v2040_v24  ;;  %v2018_v53 = vadd.f32 %v2017_v48, %v4078_v1  ;;  %s2442_s0 = sshll.u32 %s2109_s21, 4  ;;  %s486_s8 = scalar_lea.vmem [#allocation15], %s3758_s28 }
 0x276   : > { %s2128_s27 = sshll.u32 %s486_s8, 4  ;;  %s4393_s13 = sld [smem:[#allocation43_spill]]  ;;  %s4182_s27 = int_to_ptr.vmem [resolvable:$true] %s2128_s27 }
 0x277   : > { %v2019_v57 = vadd.f32 %v2018_v53, %v4055_v52  ;;  %v2056_v19 = vadd.f32 %v2055_v17, %v2041_v50  ;;  %v2046_v52 = vmul.f32 %v4088_v27, %v4088_v27  ;;  %s4395_s11 = sld [smem:[#allocation44_spill]]  ;;  %s4186_s22 = scalar_lea.sflag [#allocation14], %s419_s2 }
 0x278   : > { %s3151_s1 = scalar_lea.vmem %s4175_s24, 16  ;;  %s3355_s19 = smov [#allocation13]  }
 0x279   : > { %v2020_v8 = vadd.f32 %v2019_v57, %v4069_v40  ;;  %v2057_v59 = vadd.f32 %v2056_v19, %v2042_v55  ;;  %p3152_p6 = scmp.ne.s32.totalorder %s4175_s24, %s3151_s1  ;;  %s3155_s4 = sshll.u32 %s3355_s19, 4  ;;  %s3156_s4 = int_to_ptr.vmem [resolvable:$false] %s3155_s4 }
 0x27a   : > { %s3157_s21 = scalar_lea.vmem %s3156_s4, 32  ;;  %p3158_p0 = scmp.lt.s32.totalorder %s4175_s24, %s3156_s4 }
 0x27b   : > { %v2021_v63 = vadd.f32 %v2020_v8, %v4095_v34  ;;  %v2058_v11 = vadd.f32 %v2057_v59, %v2043_v58  ;;  %p3153_p2 = pnand %p3152_p6, %p4392_p12  ;;  %p3159_p9 = scmp.lt.s32.totalorder %s3157_s21, %s3151_s1 }
 0x27c   : > { %s4394_s6 = smov %s4393_s13  ;;  %s4173_s25 = scalar_lea.hbm %s4393_s13, %s2442_s0 }
 0x27d   : > { %v2022_v3 = vadd.f32 %v2021_v63, %v1983_v38  ;;  %v2059_v56 = vadd.f32 %v2058_v11, %v2044_v61  ;;  %s4396_s3 = smov %s4395_s11  ;;  %s4180_s14 = scalar_lea.hbm %s4395_s11, %s2442_s0 }
 0x27e   : > { %p3154_p3 = pneg %p3153_p2  ;;  %p3160_p5 = por %p3159_p9, %p3158_p0 }
 0x27f   : > { %v2023_v9 = vadd.f32 %v2022_v3, %v4088_v27  ;;  %v2060_v7 = vadd.f32 %v2059_v56, %v2045_v5 }
 0x280   : > { %p3161_p4 = pnand %p3160_p5, %p3154_p3 }
 0x281   : > { %v2024_v10 = vadd.f32 %v2023_v9, %v4104_v62  ;;  %v2061_v40 = vadd.f32 %v2060_v7, %v2046_v52 }
 0x283   : > { %v2025_v13 = vrot.slane %v2024_v10, 4  ;;  %v2062_v14 = vadd.f32 %v2061_v40, %v2047_v54 }
 0x285   : > { %v2026_v1 = vadd.f32 %v2025_v13, %v2024_v10  ;;  %v2063_v12 = vrot.slane %v2062_v14, 4 }
 0x287   : > { %v2027_v15 = vrot.slane %v2026_v1, 2  ;;  %v2064_v16 = vadd.f32 %v2063_v12, %v2062_v14 }
 0x289   : > { %v2065_v51 = vrot.slane %v2064_v16, 2  ;;  %v2028_v18 = vadd.f32 %v2027_v15, %v2026_v1 }
 0x28b   : > { %v2029_v46 = vrot.slane %v2028_v18, 1  ;;  %v2066_v20 = vadd.f32 %v2065_v51, %v2064_v16 }
 0x28d   : > { %v2030_v22 = vadd.f32 %v2029_v46, %v2028_v18  ;;  %v2067_v2 = vrot.slane %v2066_v20, 1 }
 0x28f   : > { %2031 = vst [vmem:[%s480_s7] sm:$0x1] %v2030_v22  ;;  %v2068_v26 = vadd.f32 %v2067_v2, %v2066_v20 }
 0x290   : > { %3164 = shalt.err (!%p3161_p4)
}
 0x291   : > { %s3165_s5 = scalar_lea.hbm %s4173_s25, 16  ;;  %s3169_s7 = scalar_lea.hbm %s4394_s6, 64 }
 0x292   : > { %p3166_p11 = scmp.ne.s32.totalorder %s4173_s25, %s3165_s5  ;;  %p3170_p13 = scmp.lt.u32.totalorder %s4173_s25, %s4394_s6 }
 0x293   : > { %p3171_p8 = scmp.lt.u32.totalorder %s3169_s7, %s3165_s5  ;;  %p3173_p6 = scmp.lt.u32.totalorder %s3165_s5, %s4173_s25 }
 0x294   : > { %p3167_p7 = pnand %p3166_p11, %p4392_p12 }
 0x295   : > { %p3172_p10 = por %p3171_p8, %p3170_p13 }
 0x296   : > { %p3168_p1 = pneg %p3167_p7 }
 0x297   : > { %p3174_p2 = por %p3173_p6, %p3172_p10 }
 0x299   : > { %p3175_p3 = pnand %p3174_p2, %p3168_p1 }
 0x29b   : > { %3178 = shalt.err (!%p3175_p3)
}
 0x29c   : > { %2780 = dma.vmem_to_hbm [thread:$0]  (%p4392_p12), %s4175_s24, 16, %s4173_s25, %s4186_s22   ;;  %2069 = vst [vmem:[%s486_s8] sm:$0x1] %v2068_v26 }
 0x29d   : > { %s3179_s13 = scalar_lea.vmem %s4182_s27, 16  ;;  %s3356_s18 = smov [#allocation15]  }
 0x29e   : > { %p3180_p0 = scmp.ne.s32.totalorder %s4182_s27, %s3179_s13  ;;  %s3183_s30 = sshll.u32 %s3356_s18, 4  ;;  %s3184_s30 = int_to_ptr.vmem [resolvable:$false] %s3183_s30 }
 0x29f   : > { %s3185_s11 = scalar_lea.vmem %s3184_s30, 32  ;;  %p3186_p4 = scmp.lt.s32.totalorder %s4182_s27, %s3184_s30 }
 0x2a0   : > { %p3181_p9 = pnand %p3180_p0, %p4392_p12  ;;  %p3187_p11 = scmp.lt.s32.totalorder %s3185_s11, %s3179_s13 }
 0x2a2   : > { %p3182_p5 = pneg %p3181_p9  ;;  %p3188_p7 = por %p3187_p11, %p3186_p4 }
 0x2a4   : > { %p3189_p1 = pnand %p3188_p7, %p3182_p5 }
 0x2a6   : > { %3192 = shalt.err (!%p3189_p1)
}
 0x2a7   : > { %s3193_s28 = scalar_lea.hbm %s4180_s14, 16  ;;  %s3197_s25 = scalar_lea.hbm %s4396_s3, 64 }
 0x2a8   : > { %p3194_p13 = scmp.ne.s32.totalorder %s4180_s14, %s3193_s28  ;;  %p3198_p6 = scmp.lt.u32.totalorder %s4180_s14, %s4396_s3 }
 0x2a9   : > { %p3199_p2 = scmp.lt.u32.totalorder %s3197_s25, %s3193_s28  ;;  %p3201_p0 = scmp.lt.u32.totalorder %s3193_s28, %s4180_s14 }
 0x2aa   : > { %p3195_p8 = pnand %p3194_p13, %p4392_p12 }
 0x2ab   : > { %p3200_p3 = por %p3199_p2, %p3198_p6 }
 0x2ac   : > { %p3196_p10 = pneg %p3195_p8 }
 0x2ad   : > { %p3202_p9 = por %p3201_p0, %p3200_p3 }
 0x2af   : > { %p3203_p5 = pnand %p3202_p9, %p3196_p10 }
 0x2b1   : > { %3206 = shalt.err (!%p3203_p5)
}
 0x2b2   : > { %2781 = dma.vmem_to_hbm [thread:$0]  (%p4392_p12), %s4182_s27, 16, %s4180_s14, %s4186_s22  }
 0x2b3 PF: > { %s4397_s4 = sld [smem:[#allocation37_spill]]  ;;  %p2812_p4 = scmp.ge.s32.totalorder %s3341_s16, 2 }
 0x2b4   : > { %s2140_s21 = sand.u32 1, %s3313_s9  }
 0x2b5   : > { %s2141_s5 = scalar_lea.sflag [#allocation6], %s2140_s21 }
 0x2b9   : > { %p4398_p11 = scmp.ne.s32.totalorder %s4397_s4, 0 }
 0x2bb   : > { %p2800_p7 = pnand %p2812_p4, %p4398_p11 }
 0x2bd   : > { %3280 = dma.done.wait (!%p2800_p7), %s2141_s5, 2048  }
 0x2be   : > { %3282 = vsyncadd (!%p2800_p7), %s2141_s5, 4294965248  ;;  %s4399_s2 = sadd.s32 4294967294, %s3341_s16  }
 0x2bf   : > { %s2149_s0 = sand.u32 1, %s4399_s2  }
 0x2c0   : > { %s2150_s7 = scalar_lea.sflag [#allocation14], %s2149_s0 }
 0x2c1   : > { %3284 = dma.done.wait (!%p2800_p7), %s2150_s7, 32  }
 0x2c2   : > { %3286 = vsyncadd (!%p2800_p7), %s2150_s7, 4294967264  ;;  %s32_s16 = sadd.s32 1, %s3341_s16   ;;  %s4401_s4 = sld [smem:[#allocation23_spill]] }
 0x2c3   : > { %p4241_p12 = scmp.ge.s32.totalorder %s32_s16, 6   ;;  %s4402_s5 = sld [smem:[#allocation24_spill]] }
 0x2c4   : > { %s4403_s9 = sld [smem:[#allocation25_spill]]  ;;  %s4404_s30 = sld [smem:[#allocation35_spill]] }
 0x2c5   : > { %s4405_s14 = sld [smem:[#allocation26_spill]]  ;;  %s4406_s11 = sld [smem:[#allocation36_spill]] }
 0x2c6   : > { %s4407_s22 = sld [smem:[#allocation29_spill]]  ;;  %s4408_s13 = sld [smem:[#allocation30_spill]] }
 0x2c7   : > { %s4409_s17 = sld [smem:[#allocation31_spill]]  ;;  %s4410_s15 = sld [smem:[#allocation32_spill]] }
 0x2c8   : > { %s4411_s27 = smov %s4433_s12  ;;  %s4412_s28 = smov %s3305_s29 }
 0x2c9   :  { %31 = sbr.rel (!%p4241_p12) target bundleno = 23 (0x17), region = 152 }
 0x2ca   : > { %s4413_s29 = smov %s4403_s9  ;;  %s4414_s9 = smov %s3317_s10 }
 0x2cb   : > { %s4415_s10 = smov %s4405_s14 }
 0x2cc   : > { %s4416_s12 = smov %s4407_s22 }
 0x2cd   : > { %s4417_s14 = smov %s4409_s17 }
 0x2d0   :  { %2162 = vsyncpa [#allocation5], 1 }
 0x2d1   :  { %2164 = vsyncpa [#allocation5 + $0x1], 1 }
 0x2d2   :  { %2165 = vsyncpa [#allocation8], 1 }
 0x2d3   :  { %2167 = vsyncpa [#allocation8 + $0x1], 1 }
 0x2d4   :  { %2168 = vsyncpa [#allocation11], 1 }
 0x2d5   :  { %2169 = vsyncpa [#allocation6], 1 }
 0x2d6   :  { %2171 = vsyncpa [#allocation6 + $0x1], 1 }
 0x2d7   :  { %2172 = vsyncpa [#allocation14], 1 }
 0x2d8   :  { %2174 = vsyncpa [#allocation14 + $0x1], 1 }

</bundles_post_ra>
